<compile_context>
chip_gen: v5e
topology: v5e:2x2
jax: 0.10.0
libtpu: 0.0.40
codegen_flags: <defaults>
</compile_context>

<pallas_src>
import math
import functools

import jax
import jax.numpy as jnp
from jax.experimental import pallas as pl
from jax.experimental.pallas import tpu as pltpu


def _layernorm(v, g, b, eps=1e-5):
    mu = jnp.mean(v, axis=-1, keepdims=True)
    var = jnp.mean((v - mu) ** 2, axis=-1, keepdims=True)
    return (v - mu) * jax.lax.rsqrt(var + eps) * g + b


def _gelu_exact(x):
    # F.gelu default (erf-based, not tanh approximation), kept in f32
    return 0.5 * x * (1.0 + jax.lax.erf(x * (1.0 / math.sqrt(2.0))))


def encoder_kernel(x_hbm, pe_ref, wqkv_ref, bqkv_ref, wo_ref, bo_ref,
                   w1_ref, b1_ref, w2_ref, b2_ref,
                   g1_ref, beta1_ref, g2_ref, beta2_ref,
                   out_ref, x_sc, *, num_heads):
    b = pl.program_id(0)                       # parallel batch-block axis
    l = pl.program_id(1)                       # arbitrary layer axis
    num_layers = pl.num_programs(1)

    bb, S, D = x_sc.shape
    N = bb * S
    H = num_heads
    Dh = D // H
    scale = 1.0 / math.sqrt(Dh)

    # --- PositionalEncoding: x = token_embedding + pos_encoding[:S] ---------
    # (dropout is identity in eval mode).  x enters via ANY/HBM and is DMA'd
    # once into the resident residual-stream scratch.
    @pl.when(l == 0)
    def _init():
        pltpu.sync_copy(x_hbm.at[pl.ds(b * bb, bb)], x_sc)
        x_sc[...] = x_sc[...] + pe_ref[...]

    x = x_sc[...]                               # (bb, S, D) f32 residual stream

    # ---------------- self-attention block (norm_first=True) ----------------
    xn = _layernorm(x, g1_ref[0], beta1_ref[0])                       # f32
    qkv = jnp.dot(xn.reshape(N, D).astype(jnp.bfloat16), wqkv_ref[0],
                  preferred_element_type=jnp.float32) + bqkv_ref[0]   # (N, 3D)

    # 128-aligned three-way split; fold 1/sqrt(Dh) into Q
    q = qkv[:, :D] * scale
    k = qkv[:, D:2 * D]
    v = qkv[:, 2 * D:]

    # merge (head, batch) into one leading batch axis -> 2 batched einsums
    q_h = jnp.stack([q[:, h * Dh:(h + 1) * Dh] for h in range(H)], axis=0)
    k_h = jnp.stack([k[:, h * Dh:(h + 1) * Dh] for h in range(H)], axis=0)
    v_h = jnp.stack([v[:, h * Dh:(h + 1) * Dh] for h in range(H)], axis=0)
    q_h = q_h.reshape(H * bb, S, Dh)
    k_h = k_h.reshape(H * bb, S, Dh)
    v_h = v_h.reshape(H * bb, S, Dh)

    s = jnp.einsum('nqd,nkd->nqk', q_h, k_h,
                   preferred_element_type=jnp.float32)                # (HB,S,S)
    m = jnp.max(s, axis=-1, keepdims=True)
    p = jnp.exp(s - m)
    p = p * pl.reciprocal(jnp.sum(p, axis=-1, keepdims=True), approx=True)
    ctx = jnp.einsum('nqk,nkd->nqd', p, v_h,
                     preferred_element_type=jnp.float32)              # (HB,S,Dh)

    ctx = ctx.reshape(H, N, Dh)
    ctx_full = jnp.concatenate([ctx[h] for h in range(H)], axis=-1)   # (N, D)

    attn = jnp.dot(ctx_full.astype(jnp.bfloat16), wo_ref[0],
                   preferred_element_type=jnp.float32) + bo_ref[0]
    x = x + attn.reshape(bb, S, D)              # dropout -> identity (eval)

    # ---------------- feed-forward block (norm_first=True) ------------------
    xn2 = _layernorm(x, g2_ref[0], beta2_ref[0]).reshape(N, D)
    h1 = jnp.dot(xn2.astype(jnp.bfloat16), w1_ref[0],
                 preferred_element_type=jnp.float32) + b1_ref[0]
    h1 = _gelu_exact(h1)
    ff = jnp.dot(h1.astype(jnp.bfloat16), w2_ref[0],
                 preferred_element_type=jnp.float32) + b2_ref[0]
    x = x + ff.reshape(bb, S, D)

    x_sc[...] = x

    @pl.when(l == num_layers - 1)
    def _fin():
        out_ref[...] = x.astype(out_ref.dtype)


def proj_logsoftmax_kernel(x_ref, w_ref, b_ref, out_ref):
    bb, S, D = x_ref.shape
    Vp = out_ref.shape[-1]
    N = bb * S
    logits = jnp.dot(x_ref[...].reshape(N, D).astype(jnp.bfloat16), w_ref[...],
                     preferred_element_type=jnp.float32) + b_ref[...]
    m = jnp.max(logits, axis=-1, keepdims=True)
    z = logits - m
    lse = jnp.log(jnp.sum(jnp.exp(z), axis=-1, keepdims=True))
    out_ref[...] = (z - lse).reshape(bb, S, Vp).astype(out_ref.dtype)


def make_pos_encoding(max_len, dim_model):
    pos = jnp.arange(max_len, dtype=jnp.float32)[:, None]
    div = jnp.exp(jnp.arange(0, dim_model, 2, dtype=jnp.float32)
                  * (-math.log(10000.0) / dim_model))
    pe = jnp.zeros((max_len, dim_model), dtype=jnp.float32)
    pe = pe.at[:, 0::2].set(jnp.sin(pos * div))
    pe = pe.at[:, 1::2].set(jnp.cos(pos * div))
    return pe[:, None, :]                        # (max_len, 1, D)


def transformer_forward(src, params, *, num_heads, num_layers):
    """src: (S, B) int32 token ids (PyTorch batch_first=False convention)."""
    emb = params['embedding']                    # (V, D) f32
    S, B = src.shape
    V, D = emb.shape
    F = params['w1'].shape[-1]
    assert D % 128 == 0 and S % 8 == 0 and D % num_heads == 0

    # glue: embedding gather + sqrt(D) scale (pos-encoding add happens in-kernel)
    x = jnp.take(emb, src, axis=0) * math.sqrt(D)            # (S, B, D)
    x = jnp.transpose(x, (1, 0, 2)).astype(jnp.float32)       # (B, S, D)
    pe = jnp.transpose(params['pos_encoding'][:S],
                       (1, 0, 2)).astype(jnp.float32)         # (1, S, D)

    n_b = 2 if (B % 2 == 0) else 1     # parallel batch blocks (v7x: 2 TCs)
    bb = B // n_b

    kernel = functools.partial(encoder_kernel, num_heads=num_heads)

    h = pl.pallas_call(
        kernel,
        out_shape=jax.ShapeDtypeStruct((B, S, D), jnp.float32),
        grid_spec=pltpu.PrefetchScalarGridSpec(
            num_scalar_prefetch=0,
            grid=(n_b, num_layers),
            in_specs=[
                pl.BlockSpec(memory_space=pl.ANY),                    # x (HBM)
                pl.BlockSpec((1, S, D), lambda b, l: (0, 0, 0)),      # pos enc
                pl.BlockSpec((1, D, 3 * D), lambda b, l: (l, 0, 0)),  # wqkv bf16
                pl.BlockSpec((1, 1, 3 * D), lambda b, l: (l, 0, 0)),  # bqkv
                pl.BlockSpec((1, D, D), lambda b, l: (l, 0, 0)),      # wo bf16
                pl.BlockSpec((1, 1, D), lambda b, l: (l, 0, 0)),      # bo
                pl.BlockSpec((1, D, F), lambda b, l: (l, 0, 0)),      # w1 bf16
                pl.BlockSpec((1, 1, F), lambda b, l: (l, 0, 0)),      # b1
                pl.BlockSpec((1, F, D), lambda b, l: (l, 0, 0)),      # w2 bf16
                pl.BlockSpec((1, 1, D), lambda b, l: (l, 0, 0)),      # b2
                pl.BlockSpec((1, 1, D), lambda b, l: (l, 0, 0)),      # ln1 gamma
                pl.BlockSpec((1, 1, D), lambda b, l: (l, 0, 0)),      # ln1 beta
                pl.BlockSpec((1, 1, D), lambda b, l: (l, 0, 0)),      # ln2 gamma
                pl.BlockSpec((1, 1, D), lambda b, l: (l, 0, 0)),      # ln2 beta
            ],
            out_specs=pl.BlockSpec((bb, S, D), lambda b, l: (b, 0, 0)),
            scratch_shapes=[pltpu.VMEM((bb, S, D), jnp.float32)],
        ),
        compiler_params=pltpu.CompilerParams(
            dimension_semantics=("parallel", "arbitrary"),
            vmem_limit_bytes=64 * 1024 * 1024),
    )(x, pe, params['wqkv'], params['bqkv'], params['wo'], params['bo'],
      params['w1'], params['b1'], params['w2'], params['b2'],
      params['g1'], params['beta1'], params['g2'], params['beta2'])

    # --- final projection + log_softmax: separate call, lane-dense padded V ---
    wout, bout = params['wout'], params['bout']
    Vp = ((V + 127) // 128) * 128
    if Vp != V:
        wout = jnp.pad(wout, ((0, 0), (0, Vp - V)))
        bout = jnp.pad(bout, ((0, 0), (0, Vp - V)), constant_values=-1e30)

    logp = pl.pallas_call(
        proj_logsoftmax_kernel,
        out_shape=jax.ShapeDtypeStruct((B, S, Vp), jnp.float32),
        grid_spec=pltpu.PrefetchScalarGridSpec(
            num_scalar_prefetch=0,
            grid=(n_b,),
            in_specs=[
                pl.BlockSpec((bb, S, D), lambda b: (b, 0, 0)),
                pl.BlockSpec((D, Vp), lambda b: (0, 0)),
                pl.BlockSpec((1, Vp), lambda b: (0, 0)),
            ],
            out_specs=pl.BlockSpec((bb, S, Vp), lambda b: (b, 0, 0)),
        ),
        compiler_params=pltpu.CompilerParams(
            dimension_semantics=("parallel",),
            vmem_limit_bytes=64 * 1024 * 1024),
    )(h, wout, bout)

    logp = logp[:, :, :V]
    # back to PyTorch layout: (S, B, V) log-probabilities
    return jnp.transpose(logp, (1, 0, 2))


def build_params(key, *, num_tokens, dim_model, d_hid, num_layers, n_positions):
    V, D, F, L = num_tokens, dim_model, d_hid, num_layers

    def xavier(k, shape):
        fan_in, fan_out = shape[-2], shape[-1]
        lim = math.sqrt(6.0 / (fan_in + fan_out))
        return jax.random.uniform(k, shape, jnp.float32, -lim, lim)

    ks = jax.random.split(key, 8)
    bf16 = jnp.bfloat16
    params = {
        'embedding': xavier(ks[0], (V, D)),
        'pos_encoding': make_pos_encoding(n_positions, D),
        # per-layer weights stacked along a leading layer axis; matmul weights bf16
        'wqkv': xavier(ks[1], (L, D, 3 * D)).astype(bf16),
        'bqkv': jnp.zeros((L, 1, 3 * D), jnp.float32),
        'wo': xavier(ks[2], (L, D, D)).astype(bf16),
        'bo': jnp.zeros((L, 1, D), jnp.float32),
        'w1': xavier(ks[3], (L, D, F)).astype(bf16),
        'b1': 0.01 * jax.random.normal(ks[4], (L, 1, F), jnp.float32),
        'w2': xavier(ks[5], (L, F, D)).astype(bf16),
        'b2': 0.01 * jax.random.normal(ks[6], (L, 1, D), jnp.float32),
        'g1': jnp.ones((L, 1, D), jnp.float32),
        'beta1': jnp.zeros((L, 1, D), jnp.float32),
        'g2': jnp.ones((L, 1, D), jnp.float32),
        'beta2': jnp.zeros((L, 1, D), jnp.float32),
        'wout': xavier(ks[7], (D, V)).astype(bf16),
        'bout': jnp.zeros((1, V), jnp.float32),
    }
    return params


if __name__ == "__main__":
    # Small shapes consistent with the module (scaled down from
    # dim_model=768, num_heads=12, d_hid=3072, num_layers=12, n_positions=80).
    SEQ, BATCH = 8, 2
    DIM_MODEL, NUM_HEADS, D_HID, NUM_LAYERS = 128, 4, 256, 2
    NUM_TOKENS = 128
    N_POSITIONS = 16

    key = jax.random.PRNGKey(0)
    pkey, skey = jax.random.split(key)
    params = build_params(pkey, num_tokens=NUM_TOKENS, dim_model=DIM_MODEL,
                          d_hid=D_HID, num_layers=NUM_LAYERS,
                          n_positions=N_POSITIONS)

    # src: (S, B) int token ids, like the PyTorch module (batch_first=False)
    src = jax.random.randint(skey, (SEQ, BATCH), 0, NUM_TOKENS, dtype=jnp.int32)

    log_probs = transformer_forward(src, params, num_heads=NUM_HEADS,
                                    num_layers=NUM_LAYERS)
    log_probs = jax.block_until_ready(log_probs)

    assert log_probs.shape == (SEQ, BATCH, NUM_TOKENS)
    assert bool(jnp.all(jnp.isfinite(log_probs)))
    # log_softmax rows must (log-)sum to ~1
    row_sums = jnp.sum(jnp.exp(log_probs), axis=-1)
    assert bool(jnp.all(jnp.abs(row_sums - 1.0) < 1e-3))

    print("KERNEL_OK")
</pallas_src>

<mosaic_0001>
module attributes {stable_mosaic.version = 11 : i64} {
  func.func @encoder_kernel(%arg0: i32, %arg1: i32, %arg2: memref<2x8x128xf32, #tpu.memory_space<any>>, %arg3: memref<1x8x128xf32, #tpu.memory_space<vmem>>, %arg4: memref<1x128x384xbf16, #tpu.memory_space<vmem>>, %arg5: memref<1x1x384xf32, #tpu.memory_space<vmem>>, %arg6: memref<1x128x128xbf16, #tpu.memory_space<vmem>>, %arg7: memref<1x1x128xf32, #tpu.memory_space<vmem>>, %arg8: memref<1x128x256xbf16, #tpu.memory_space<vmem>>, %arg9: memref<1x1x256xf32, #tpu.memory_space<vmem>>, %arg10: memref<1x256x128xbf16, #tpu.memory_space<vmem>>, %arg11: memref<1x1x128xf32, #tpu.memory_space<vmem>>, %arg12: memref<1x1x128xf32, #tpu.memory_space<vmem>>, %arg13: memref<1x1x128xf32, #tpu.memory_space<vmem>>, %arg14: memref<1x1x128xf32, #tpu.memory_space<vmem>>, %arg15: memref<1x1x128xf32, #tpu.memory_space<vmem>>, %arg16: memref<1x8x128xf32, #tpu.memory_space<vmem>>, %arg17: memref<1x8x128xf32, #tpu.memory_space<vmem>>) attributes {dimension_semantics = [#tpu.dimension_semantics<parallel>, #tpu.dimension_semantics<arbitrary>], iteration_bounds = array<i64: 2, 2>, scalar_prefetch = 0 : i64, scratch_operands = 1 : i64, tpu.core_type = #tpu.core_type<tc>, window_params = [{}, {pipeline_mode = #tpu.pipeline_mode<synchronous>, transform_indices = @transform_1, window_bounds = array<i64: 1, 8, 128>}, {transform_indices = @transform_2, window_bounds = array<i64: 1, 128, 384>}, {transform_indices = @transform_3, window_bounds = array<i64: 1, 1, 384>}, {transform_indices = @transform_4, window_bounds = array<i64: 1, 128, 128>}, {transform_indices = @transform_5, window_bounds = array<i64: 1, 1, 128>}, {transform_indices = @transform_6, window_bounds = array<i64: 1, 128, 256>}, {transform_indices = @transform_7, window_bounds = array<i64: 1, 1, 256>}, {transform_indices = @transform_8, window_bounds = array<i64: 1, 256, 128>}, {transform_indices = @transform_9, window_bounds = array<i64: 1, 1, 128>}, {transform_indices = @transform_10, window_bounds = array<i64: 1, 1, 128>}, {transform_indices = @transform_11, window_bounds = array<i64: 1, 1, 128>}, {transform_indices = @transform_12, window_bounds = array<i64: 1, 1, 128>}, {transform_indices = @transform_13, window_bounds = array<i64: 1, 1, 128>}, {transform_indices = @transform_14, window_bounds = array<i64: 1, 8, 128>}]} {
    %c0_i32 = arith.constant 0 : i32
    %0 = arith.cmpi eq, %arg1, %c0_i32 : i32
    %1 = arith.extui %0 : i1 to i32
    %c0_i32_0 = arith.constant 0 : i32
    %2 = arith.cmpi ne, %1, %c0_i32_0 : i32
    scf.if %2 {
      %c1_i32_64 = arith.constant 1 : i32
      %163 = arith.muli %arg0, %c1_i32_64 : i32
      "tpu.region"() ({
        %168 = tpu.sem_alloc : memref<!tpu.dma_semaphore, #tpu.memory_space<semaphore_mem>>
        %c0_i32_74 = arith.constant 0 : i32
        %c0_i32_75 = arith.constant 0 : i32
        %169 = tpu.memref_slice %arg2[%163, %c0_i32_74, %c0_i32_75] : memref<2x8x128xf32, #tpu.memory_space<any>> -> memref<1x8x128xf32, #tpu.memory_space<any>>
        tpu.enqueue_dma source(%169 : memref<1x8x128xf32, #tpu.memory_space<any>>) target(%arg17 : memref<1x8x128xf32, #tpu.memory_space<vmem>>) target_semaphore(%168 : memref<!tpu.dma_semaphore, #tpu.memory_space<semaphore_mem>>)
        %c0_i32_76 = arith.constant 0 : i32
        %c0_i32_77 = arith.constant 0 : i32
        %170 = tpu.memref_slice %arg2[%163, %c0_i32_76, %c0_i32_77] : memref<2x8x128xf32, #tpu.memory_space<any>> -> memref<1x8x128xf32, #tpu.memory_space<any>>
        tpu.wait_dma2 semaphore(%168 : memref<!tpu.dma_semaphore, #tpu.memory_space<semaphore_mem>>) src(%170 : memref<1x8x128xf32, #tpu.memory_space<any>>) dst(%arg17 : memref<1x8x128xf32, #tpu.memory_space<vmem>>)
        tpu.yield
      }) : () -> ()
      %c0_65 = arith.constant 0 : index
      %c0_66 = arith.constant 0 : index
      %c0_67 = arith.constant 0 : index
      %164 = vector.load %arg17[%c0_65, %c0_66, %c0_67] : memref<1x8x128xf32, #tpu.memory_space<vmem>>, vector<1x8x128xf32>
      %c0_68 = arith.constant 0 : index
      %c0_69 = arith.constant 0 : index
      %c0_70 = arith.constant 0 : index
      %165 = vector.load %arg3[%c0_68, %c0_69, %c0_70] : memref<1x8x128xf32, #tpu.memory_space<vmem>>, vector<1x8x128xf32>
      %166 = arith.addf %164, %165 : vector<1x8x128xf32>
      %c0_71 = arith.constant 0 : index
      %c0_72 = arith.constant 0 : index
      %c0_73 = arith.constant 0 : index
      %167 = vector.load %arg17[%c0_71, %c0_72, %c0_73] : memref<1x8x128xf32, #tpu.memory_space<vmem>>, vector<1x8x128xf32>
      tpu.vector_store %arg17[%c0_71, %c0_72, %c0_73], %166 {strides = array<i32>} : memref<1x8x128xf32, #tpu.memory_space<vmem>>, vector<1x8x128xf32>,
    } else {
    }
    %c0 = arith.constant 0 : index
    %c0_1 = arith.constant 0 : index
    %c0_2 = arith.constant 0 : index
    %3 = vector.load %arg17[%c0, %c0_1, %c0_2] : memref<1x8x128xf32, #tpu.memory_space<vmem>>, vector<1x8x128xf32>
    %c0_3 = arith.constant 0 : index
    %c0_4 = arith.constant 0 : index
    %c0_5 = arith.constant 0 : index
    %4 = vector.load %arg12[%c0_3, %c0_4, %c0_5] : memref<1x1x128xf32, #tpu.memory_space<vmem>>, vector<1x1x128xf32>
    %5 = vector.shape_cast %4 : vector<1x1x128xf32> to vector<1x128xf32>
    %c0_6 = arith.constant 0 : index
    %c0_7 = arith.constant 0 : index
    %c0_8 = arith.constant 0 : index
    %6 = vector.load %arg13[%c0_6, %c0_7, %c0_8] : memref<1x1x128xf32, #tpu.memory_space<vmem>>, vector<1x1x128xf32>
    %7 = vector.shape_cast %6 : vector<1x1x128xf32> to vector<1x128xf32>
    %cst = arith.constant dense<0.000000e+00> : vector<1x8xf32>
    %8 = vector.multi_reduction <add>, %3, %cst [2] : vector<1x8x128xf32> to vector<1x8xf32>
    %9 = vector.shape_cast %8 : vector<1x8xf32> to vector<1x8x1xf32>
    %cst_9 = arith.constant 1.280000e+02 : f32
    %10 = vector.broadcast %cst_9 : f32 to vector<1x8x1xf32>
    %11 = arith.divf %9, %10 : vector<1x8x1xf32>
    %12 = vector.broadcast %11 : vector<1x8x1xf32> to vector<1x8x128xf32>
    %13 = arith.subf %3, %12 : vector<1x8x128xf32>
    %14 = arith.mulf %13, %13 : vector<1x8x128xf32>
    %cst_10 = arith.constant dense<0.000000e+00> : vector<1x8xf32>
    %15 = vector.multi_reduction <add>, %14, %cst_10 [2] : vector<1x8x128xf32> to vector<1x8xf32>
    %16 = vector.shape_cast %15 : vector<1x8xf32> to vector<1x8x1xf32>
    %cst_11 = arith.constant 1.280000e+02 : f32
    %17 = vector.broadcast %cst_11 : f32 to vector<1x8x1xf32>
    %18 = arith.divf %16, %17 : vector<1x8x1xf32>
    %19 = vector.broadcast %11 : vector<1x8x1xf32> to vector<1x8x128xf32>
    %20 = arith.subf %3, %19 : vector<1x8x128xf32>
    %cst_12 = arith.constant 9.99999974E-6 : f32
    %21 = vector.broadcast %cst_12 : f32 to vector<1x8x1xf32>
    %22 = arith.addf %18, %21 : vector<1x8x1xf32>
    %23 = math.rsqrt %22 : vector<1x8x1xf32>
    %24 = vector.broadcast %23 : vector<1x8x1xf32> to vector<1x8x128xf32>
    %25 = arith.mulf %20, %24 : vector<1x8x128xf32>
    %26 = vector.shape_cast %5 : vector<1x128xf32> to vector<1x1x128xf32>
    %27 = vector.broadcast %26 : vector<1x1x128xf32> to vector<1x8x128xf32>
    %28 = arith.mulf %25, %27 : vector<1x8x128xf32>
    %29 = vector.shape_cast %7 : vector<1x128xf32> to vector<1x1x128xf32>
    %30 = vector.broadcast %29 : vector<1x1x128xf32> to vector<1x8x128xf32>
    %31 = arith.addf %28, %30 : vector<1x8x128xf32>
    %32 = vector.shape_cast %31 : vector<1x8x128xf32> to vector<8x128xf32>
    %33 = arith.truncf %32 : vector<8x128xf32> to vector<8x128xbf16>
    %c0_13 = arith.constant 0 : index
    %c0_14 = arith.constant 0 : index
    %c0_15 = arith.constant 0 : index
    %34 = vector.load %arg4[%c0_13, %c0_14, %c0_15] : memref<1x128x384xbf16, #tpu.memory_space<vmem>>, vector<1x128x384xbf16>
    %35 = vector.shape_cast %34 : vector<1x128x384xbf16> to vector<128x384xbf16>
    %cst_16 = arith.constant dense<0.000000e+00> : vector<8x384xf32>
    %36 = tpu.matmul %33, %35, %cst_16 {dimension_numbers = #tpu.dot_dimension_numbers<[1], [0], [0], [1], [0, 0, 1, 1], [], []>} : vector<8x128xbf16>, vector<128x384xbf16>, vector<8x384xf32> -> vector<8x384xf32>
    %c0_17 = arith.constant 0 : index
    %c0_18 = arith.constant 0 : index
    %c0_19 = arith.constant 0 : index
    %37 = vector.load %arg5[%c0_17, %c0_18, %c0_19] : memref<1x1x384xf32, #tpu.memory_space<vmem>>, vector<1x1x384xf32>
    %38 = vector.shape_cast %37 : vector<1x1x384xf32> to vector<1x384xf32>
    %39 = vector.broadcast %38 : vector<1x384xf32> to vector<8x384xf32>
    %40 = arith.addf %36, %39 : vector<8x384xf32>
    %41 = vector.extract_strided_slice %40 {offsets = [0, 0], sizes = [8, 128], strides = [1, 1]} : vector<8x384xf32> to vector<8x128xf32>
    %cst_20 = arith.constant 0.176776692 : f32
    %42 = vector.broadcast %cst_20 : f32 to vector<8x128xf32>
    %43 = arith.mulf %41, %42 : vector<8x128xf32>
    %44 = vector.extract_strided_slice %40 {offsets = [0, 128], sizes = [8, 128], strides = [1, 1]} : vector<8x384xf32> to vector<8x128xf32>
    %45 = vector.extract_strided_slice %40 {offsets = [0, 256], sizes = [8, 128], strides = [1, 1]} : vector<8x384xf32> to vector<8x128xf32>
    %46 = vector.extract_strided_slice %43 {offsets = [0, 0], sizes = [8, 32], strides = [1, 1]} : vector<8x128xf32> to vector<8x32xf32>
    %47 = vector.extract_strided_slice %43 {offsets = [0, 32], sizes = [8, 32], strides = [1, 1]} : vector<8x128xf32> to vector<8x32xf32>
    %48 = vector.extract_strided_slice %43 {offsets = [0, 64], sizes = [8, 32], strides = [1, 1]} : vector<8x128xf32> to vector<8x32xf32>
    %49 = vector.extract_strided_slice %43 {offsets = [0, 96], sizes = [8, 32], strides = [1, 1]} : vector<8x128xf32> to vector<8x32xf32>
    %50 = vector.shape_cast %46 : vector<8x32xf32> to vector<1x8x32xf32>
    %51 = vector.shape_cast %47 : vector<8x32xf32> to vector<1x8x32xf32>
    %52 = vector.shape_cast %48 : vector<8x32xf32> to vector<1x8x32xf32>
    %53 = vector.shape_cast %49 : vector<8x32xf32> to vector<1x8x32xf32>
    %54 = tpu.concatenate %50, %51, %52, %53 in 0 : vector<1x8x32xf32>, vector<1x8x32xf32>, vector<1x8x32xf32>, vector<1x8x32xf32> -> vector<4x8x32xf32>
    %55 = vector.extract_strided_slice %44 {offsets = [0, 0], sizes = [8, 32], strides = [1, 1]} : vector<8x128xf32> to vector<8x32xf32>
    %56 = vector.extract_strided_slice %44 {offsets = [0, 32], sizes = [8, 32], strides = [1, 1]} : vector<8x128xf32> to vector<8x32xf32>
    %57 = vector.extract_strided_slice %44 {offsets = [0, 64], sizes = [8, 32], strides = [1, 1]} : vector<8x128xf32> to vector<8x32xf32>
    %58 = vector.extract_strided_slice %44 {offsets = [0, 96], sizes = [8, 32], strides = [1, 1]} : vector<8x128xf32> to vector<8x32xf32>
    %59 = vector.shape_cast %55 : vector<8x32xf32> to vector<1x8x32xf32>
    %60 = vector.shape_cast %56 : vector<8x32xf32> to vector<1x8x32xf32>
    %61 = vector.shape_cast %57 : vector<8x32xf32> to vector<1x8x32xf32>
    %62 = vector.shape_cast %58 : vector<8x32xf32> to vector<1x8x32xf32>
    %63 = tpu.concatenate %59, %60, %61, %62 in 0 : vector<1x8x32xf32>, vector<1x8x32xf32>, vector<1x8x32xf32>, vector<1x8x32xf32> -> vector<4x8x32xf32>
    %64 = vector.extract_strided_slice %45 {offsets = [0, 0], sizes = [8, 32], strides = [1, 1]} : vector<8x128xf32> to vector<8x32xf32>
    %65 = vector.extract_strided_slice %45 {offsets = [0, 32], sizes = [8, 32], strides = [1, 1]} : vector<8x128xf32> to vector<8x32xf32>
    %66 = vector.extract_strided_slice %45 {offsets = [0, 64], sizes = [8, 32], strides = [1, 1]} : vector<8x128xf32> to vector<8x32xf32>
    %67 = vector.extract_strided_slice %45 {offsets = [0, 96], sizes = [8, 32], strides = [1, 1]} : vector<8x128xf32> to vector<8x32xf32>
    %68 = vector.shape_cast %64 : vector<8x32xf32> to vector<1x8x32xf32>
    %69 = vector.shape_cast %65 : vector<8x32xf32> to vector<1x8x32xf32>
    %70 = vector.shape_cast %66 : vector<8x32xf32> to vector<1x8x32xf32>
    %71 = vector.shape_cast %67 : vector<8x32xf32> to vector<1x8x32xf32>
    %72 = tpu.concatenate %68, %69, %70, %71 in 0 : vector<1x8x32xf32>, vector<1x8x32xf32>, vector<1x8x32xf32>, vector<1x8x32xf32> -> vector<4x8x32xf32>
    "tpu.trace_start"() <{level = 10 : i32, message = "nqd,nkd->nqk"}> : () -> ()
    %cst_21 = arith.constant dense<0.000000e+00> : vector<4x8x8xf32>
    %73 = tpu.matmul %54, %63, %cst_21 {dimension_numbers = #tpu.dot_dimension_numbers<[2], [2], [1], [1], [0, 0, 0, 1, 1, 1], [0], [0]>} : vector<4x8x32xf32>, vector<4x8x32xf32>, vector<4x8x8xf32> -> vector<4x8x8xf32>
    "tpu.trace_stop"() : () -> ()
    %cst_22 = arith.constant dense<0xFF800000> : vector<4x8xf32>
    %74 = vector.multi_reduction <maximumf>, %73, %cst_22 [2] : vector<4x8x8xf32> to vector<4x8xf32>
    %75 = vector.shape_cast %74 : vector<4x8xf32> to vector<4x8x1xf32>
    %76 = vector.broadcast %75 : vector<4x8x1xf32> to vector<4x8x8xf32>
    %77 = arith.subf %73, %76 : vector<4x8x8xf32>
    %78 = math.exp %77 : vector<4x8x8xf32>
    %cst_23 = arith.constant dense<0.000000e+00> : vector<4x8xf32>
    %79 = vector.multi_reduction <add>, %78, %cst_23 [2] : vector<4x8x8xf32> to vector<4x8xf32>
    %80 = vector.shape_cast %79 : vector<4x8xf32> to vector<4x8x1xf32>
    %81 = tpu.reciprocal %80 {approx = true} : vector<4x8x1xf32> -> vector<4x8x1xf32>
    %82 = vector.broadcast %81 : vector<4x8x1xf32> to vector<4x8x8xf32>
    %83 = arith.mulf %78, %82 : vector<4x8x8xf32>
    "tpu.trace_start"() <{level = 10 : i32, message = "nqk,nkd->nqd"}> : () -> ()
    %cst_24 = arith.constant dense<0.000000e+00> : vector<4x8x32xf32>
    %84 = tpu.matmul %83, %72, %cst_24 {dimension_numbers = #tpu.dot_dimension_numbers<[2], [1], [1], [2], [0, 0, 0, 1, 1, 2], [0], [0]>} : vector<4x8x8xf32>, vector<4x8x32xf32>, vector<4x8x32xf32> -> vector<4x8x32xf32>
    "tpu.trace_stop"() : () -> ()
    %85 = vector.extract_strided_slice %84 {offsets = [0, 0, 0], sizes = [1, 8, 32], strides = [1, 1, 1]} : vector<4x8x32xf32> to vector<1x8x32xf32>
    %86 = vector.shape_cast %85 : vector<1x8x32xf32> to vector<8x32xf32>
    %87 = vector.extract_strided_slice %84 {offsets = [1, 0, 0], sizes = [1, 8, 32], strides = [1, 1, 1]} : vector<4x8x32xf32> to vector<1x8x32xf32>
    %88 = vector.shape_cast %87 : vector<1x8x32xf32> to vector<8x32xf32>
    %89 = vector.extract_strided_slice %84 {offsets = [2, 0, 0], sizes = [1, 8, 32], strides = [1, 1, 1]} : vector<4x8x32xf32> to vector<1x8x32xf32>
    %90 = vector.shape_cast %89 : vector<1x8x32xf32> to vector<8x32xf32>
    %91 = vector.extract_strided_slice %84 {offsets = [3, 0, 0], sizes = [1, 8, 32], strides = [1, 1, 1]} : vector<4x8x32xf32> to vector<1x8x32xf32>
    %92 = vector.shape_cast %91 : vector<1x8x32xf32> to vector<8x32xf32>
    %93 = tpu.concatenate %86, %88, %90, %92 in 1 : vector<8x32xf32>, vector<8x32xf32>, vector<8x32xf32>, vector<8x32xf32> -> vector<8x128xf32>
    %94 = arith.truncf %93 : vector<8x128xf32> to vector<8x128xbf16>
    %c0_25 = arith.constant 0 : index
    %c0_26 = arith.constant 0 : index
    %c0_27 = arith.constant 0 : index
    %95 = vector.load %arg6[%c0_25, %c0_26, %c0_27] : memref<1x128x128xbf16, #tpu.memory_space<vmem>>, vector<1x128x128xbf16>
    %96 = vector.shape_cast %95 : vector<1x128x128xbf16> to vector<128x128xbf16>
    %cst_28 = arith.constant dense<0.000000e+00> : vector<8x128xf32>
    %97 = tpu.matmul %94, %96, %cst_28 {dimension_numbers = #tpu.dot_dimension_numbers<[1], [0], [0], [1], [0, 0, 1, 1], [], []>} : vector<8x128xbf16>, vector<128x128xbf16>, vector<8x128xf32> -> vector<8x128xf32>
    %c0_29 = arith.constant 0 : index
    %c0_30 = arith.constant 0 : index
    %c0_31 = arith.constant 0 : index
    %98 = vector.load %arg7[%c0_29, %c0_30, %c0_31] : memref<1x1x128xf32, #tpu.memory_space<vmem>>, vector<1x1x128xf32>
    %99 = vector.shape_cast %98 : vector<1x1x128xf32> to vector<1x128xf32>
    %100 = vector.broadcast %99 : vector<1x128xf32> to vector<8x128xf32>
    %101 = arith.addf %97, %100 : vector<8x128xf32>
    %102 = vector.shape_cast %101 : vector<8x128xf32> to vector<1x8x128xf32>
    %103 = arith.addf %3, %102 : vector<1x8x128xf32>
    %c0_32 = arith.constant 0 : index
    %c0_33 = arith.constant 0 : index
    %c0_34 = arith.constant 0 : index
    %104 = vector.load %arg14[%c0_32, %c0_33, %c0_34] : memref<1x1x128xf32, #tpu.memory_space<vmem>>, vector<1x1x128xf32>
    %105 = vector.shape_cast %104 : vector<1x1x128xf32> to vector<1x128xf32>
    %c0_35 = arith.constant 0 : index
    %c0_36 = arith.constant 0 : index
    %c0_37 = arith.constant 0 : index
    %106 = vector.load %arg15[%c0_35, %c0_36, %c0_37] : memref<1x1x128xf32, #tpu.memory_space<vmem>>, vector<1x1x128xf32>
    %107 = vector.shape_cast %106 : vector<1x1x128xf32> to vector<1x128xf32>
    %cst_38 = arith.constant dense<0.000000e+00> : vector<1x8xf32>
    %108 = vector.multi_reduction <add>, %103, %cst_38 [2] : vector<1x8x128xf32> to vector<1x8xf32>
    %109 = vector.shape_cast %108 : vector<1x8xf32> to vector<1x8x1xf32>
    %cst_39 = arith.constant 1.280000e+02 : f32
    %110 = vector.broadcast %cst_39 : f32 to vector<1x8x1xf32>
    %111 = arith.divf %109, %110 : vector<1x8x1xf32>
    %112 = vector.broadcast %111 : vector<1x8x1xf32> to vector<1x8x128xf32>
    %113 = arith.subf %103, %112 : vector<1x8x128xf32>
    %114 = arith.mulf %113, %113 : vector<1x8x128xf32>
    %cst_40 = arith.constant dense<0.000000e+00> : vector<1x8xf32>
    %115 = vector.multi_reduction <add>, %114, %cst_40 [2] : vector<1x8x128xf32> to vector<1x8xf32>
    %116 = vector.shape_cast %115 : vector<1x8xf32> to vector<1x8x1xf32>
    %cst_41 = arith.constant 1.280000e+02 : f32
    %117 = vector.broadcast %cst_41 : f32 to vector<1x8x1xf32>
    %118 = arith.divf %116, %117 : vector<1x8x1xf32>
    %119 = vector.broadcast %111 : vector<1x8x1xf32> to vector<1x8x128xf32>
    %120 = arith.subf %103, %119 : vector<1x8x128xf32>
    %cst_42 = arith.constant 9.99999974E-6 : f32
    %121 = vector.broadcast %cst_42 : f32 to vector<1x8x1xf32>
    %122 = arith.addf %118, %121 : vector<1x8x1xf32>
    %123 = math.rsqrt %122 : vector<1x8x1xf32>
    %124 = vector.broadcast %123 : vector<1x8x1xf32> to vector<1x8x128xf32>
    %125 = arith.mulf %120, %124 : vector<1x8x128xf32>
    %126 = vector.shape_cast %105 : vector<1x128xf32> to vector<1x1x128xf32>
    %127 = vector.broadcast %126 : vector<1x1x128xf32> to vector<1x8x128xf32>
    %128 = arith.mulf %125, %127 : vector<1x8x128xf32>
    %129 = vector.shape_cast %107 : vector<1x128xf32> to vector<1x1x128xf32>
    %130 = vector.broadcast %129 : vector<1x1x128xf32> to vector<1x8x128xf32>
    %131 = arith.addf %128, %130 : vector<1x8x128xf32>
    %132 = vector.shape_cast %131 : vector<1x8x128xf32> to vector<8x128xf32>
    %133 = arith.truncf %132 : vector<8x128xf32> to vector<8x128xbf16>
    %c0_43 = arith.constant 0 : index
    %c0_44 = arith.constant 0 : index
    %c0_45 = arith.constant 0 : index
    %134 = vector.load %arg8[%c0_43, %c0_44, %c0_45] : memref<1x128x256xbf16, #tpu.memory_space<vmem>>, vector<1x128x256xbf16>
    %135 = vector.shape_cast %134 : vector<1x128x256xbf16> to vector<128x256xbf16>
    %cst_46 = arith.constant dense<0.000000e+00> : vector<8x256xf32>
    %136 = tpu.matmul %133, %135, %cst_46 {dimension_numbers = #tpu.dot_dimension_numbers<[1], [0], [0], [1], [0, 0, 1, 1], [], []>} : vector<8x128xbf16>, vector<128x256xbf16>, vector<8x256xf32> -> vector<8x256xf32>
    %c0_47 = arith.constant 0 : index
    %c0_48 = arith.constant 0 : index
    %c0_49 = arith.constant 0 : index
    %137 = vector.load %arg9[%c0_47, %c0_48, %c0_49] : memref<1x1x256xf32, #tpu.memory_space<vmem>>, vector<1x1x256xf32>
    %138 = vector.shape_cast %137 : vector<1x1x256xf32> to vector<1x256xf32>
    %139 = vector.broadcast %138 : vector<1x256xf32> to vector<8x256xf32>
    %140 = arith.addf %136, %139 : vector<8x256xf32>
    %cst_50 = arith.constant 5.000000e-01 : f32
    %141 = vector.broadcast %cst_50 : f32 to vector<8x256xf32>
    %142 = arith.mulf %141, %140 : vector<8x256xf32>
    %cst_51 = arith.constant 0.707106769 : f32
    %143 = vector.broadcast %cst_51 : f32 to vector<8x256xf32>
    %144 = arith.mulf %140, %143 : vector<8x256xf32>
    %145 = math.erf %144 : vector<8x256xf32>
    %cst_52 = arith.constant 1.000000e+00 : f32
    %146 = vector.broadcast %cst_52 : f32 to vector<8x256xf32>
    %147 = arith.addf %146, %145 : vector<8x256xf32>
    %148 = arith.mulf %142, %147 : vector<8x256xf32>
    %149 = arith.truncf %148 : vector<8x256xf32> to vector<8x256xbf16>
    %c0_53 = arith.constant 0 : index
    %c0_54 = arith.constant 0 : index
    %c0_55 = arith.constant 0 : index
    %150 = vector.load %arg10[%c0_53, %c0_54, %c0_55] : memref<1x256x128xbf16, #tpu.memory_space<vmem>>, vector<1x256x128xbf16>
    %151 = vector.shape_cast %150 : vector<1x256x128xbf16> to vector<256x128xbf16>
    %cst_56 = arith.constant dense<0.000000e+00> : vector<8x128xf32>
    %152 = tpu.matmul %149, %151, %cst_56 {dimension_numbers = #tpu.dot_dimension_numbers<[1], [0], [0], [1], [0, 0, 1, 1], [], []>} : vector<8x256xbf16>, vector<256x128xbf16>, vector<8x128xf32> -> vector<8x128xf32>
    %c0_57 = arith.constant 0 : index
    %c0_58 = arith.constant 0 : index
    %c0_59 = arith.constant 0 : index
    %153 = vector.load %arg11[%c0_57, %c0_58, %c0_59] : memref<1x1x128xf32, #tpu.memory_space<vmem>>, vector<1x1x128xf32>
    %154 = vector.shape_cast %153 : vector<1x1x128xf32> to vector<1x128xf32>
    %155 = vector.broadcast %154 : vector<1x128xf32> to vector<8x128xf32>
    %156 = arith.addf %152, %155 : vector<8x128xf32>
    %157 = vector.shape_cast %156 : vector<8x128xf32> to vector<1x8x128xf32>
    %158 = arith.addf %103, %157 : vector<1x8x128xf32>
    %c0_60 = arith.constant 0 : index
    %c0_61 = arith.constant 0 : index
    %c0_62 = arith.constant 0 : index
    %159 = vector.load %arg17[%c0_60, %c0_61, %c0_62] : memref<1x8x128xf32, #tpu.memory_space<vmem>>, vector<1x8x128xf32>
    tpu.vector_store %arg17[%c0_60, %c0_61, %c0_62], %158 {strides = array<i32>} : memref<1x8x128xf32, #tpu.memory_space<vmem>>, vector<1x8x128xf32>,
    %c1_i32 = arith.constant 1 : i32
    %160 = arith.cmpi eq, %arg1, %c1_i32 : i32
    %161 = arith.extui %160 : i1 to i32
    %c0_i32_63 = arith.constant 0 : i32
    %162 = arith.cmpi ne, %161, %c0_i32_63 : i32
    scf.if %162 {
      %c0_64 = arith.constant 0 : index
      %c0_65 = arith.constant 0 : index
      %c0_66 = arith.constant 0 : index
      %163 = vector.load %arg16[%c0_64, %c0_65, %c0_66] : memref<1x8x128xf32, #tpu.memory_space<vmem>>, vector<1x8x128xf32>
      tpu.vector_store %arg16[%c0_64, %c0_65, %c0_66], %158 {strides = array<i32>} : memref<1x8x128xf32, #tpu.memory_space<vmem>>, vector<1x8x128xf32>,
    } else {
    }
    return
  }
  func.func @transform_1(%arg0: i32, %arg1: i32) -> (i32, i32, i32) {
    %c0_i32 = arith.constant 0 : i32
    %c0_i32_0 = arith.constant 0 : i32
    %c0_i32_1 = arith.constant 0 : i32
    %c0_i32_2 = arith.constant 0 : i32
    return %c0_i32, %c0_i32_0, %c0_i32_1 : i32, i32, i32
  }
  func.func @transform_2(%arg0: i32, %arg1: i32) -> (i32, i32, i32) {
    %c0_i32 = arith.constant 0 : i32
    %c0_i32_0 = arith.constant 0 : i32
    %c0_i32_1 = arith.constant 0 : i32
    return %arg1, %c0_i32, %c0_i32_0 : i32, i32, i32
  }
  func.func @transform_3(%arg0: i32, %arg1: i32) -> (i32, i32, i32) {
    %c0_i32 = arith.constant 0 : i32
    %c0_i32_0 = arith.constant 0 : i32
    %c0_i32_1 = arith.constant 0 : i32
    return %arg1, %c0_i32, %c0_i32_0 : i32, i32, i32
  }
  func.func @transform_4(%arg0: i32, %arg1: i32) -> (i32, i32, i32) {
    %c0_i32 = arith.constant 0 : i32
    %c0_i32_0 = arith.constant 0 : i32
    %c0_i32_1 = arith.constant 0 : i32
    return %arg1, %c0_i32, %c0_i32_0 : i32, i32, i32
  }
  func.func @transform_5(%arg0: i32, %arg1: i32) -> (i32, i32, i32) {
    %c0_i32 = arith.constant 0 : i32
    %c0_i32_0 = arith.constant 0 : i32
    %c0_i32_1 = arith.constant 0 : i32
    return %arg1, %c0_i32, %c0_i32_0 : i32, i32, i32
  }
  func.func @transform_6(%arg0: i32, %arg1: i32) -> (i32, i32, i32) {
    %c0_i32 = arith.constant 0 : i32
    %c0_i32_0 = arith.constant 0 : i32
    %c0_i32_1 = arith.constant 0 : i32
    return %arg1, %c0_i32, %c0_i32_0 : i32, i32, i32
  }
  func.func @transform_7(%arg0: i32, %arg1: i32) -> (i32, i32, i32) {
    %c0_i32 = arith.constant 0 : i32
    %c0_i32_0 = arith.constant 0 : i32
    %c0_i32_1 = arith.constant 0 : i32
    return %arg1, %c0_i32, %c0_i32_0 : i32, i32, i32
  }
  func.func @transform_8(%arg0: i32, %arg1: i32) -> (i32, i32, i32) {
    %c0_i32 = arith.constant 0 : i32
    %c0_i32_0 = arith.constant 0 : i32
    %c0_i32_1 = arith.constant 0 : i32
    return %arg1, %c0_i32, %c0_i32_0 : i32, i32, i32
  }
  func.func @transform_9(%arg0: i32, %arg1: i32) -> (i32, i32, i32) {
    %c0_i32 = arith.constant 0 : i32
    %c0_i32_0 = arith.constant 0 : i32
    %c0_i32_1 = arith.constant 0 : i32
    return %arg1, %c0_i32, %c0_i32_0 : i32, i32, i32
  }
  func.func @transform_10(%arg0: i32, %arg1: i32) -> (i32, i32, i32) {
    %c0_i32 = arith.constant 0 : i32
    %c0_i32_0 = arith.constant 0 : i32
    %c0_i32_1 = arith.constant 0 : i32
    return %arg1, %c0_i32, %c0_i32_0 : i32, i32, i32
  }
  func.func @transform_11(%arg0: i32, %arg1: i32) -> (i32, i32, i32) {
    %c0_i32 = arith.constant 0 : i32
    %c0_i32_0 = arith.constant 0 : i32
    %c0_i32_1 = arith.constant 0 : i32
    return %arg1, %c0_i32, %c0_i32_0 : i32, i32, i32
  }
  func.func @transform_12(%arg0: i32, %arg1: i32) -> (i32, i32, i32) {
    %c0_i32 = arith.constant 0 : i32
    %c0_i32_0 = arith.constant 0 : i32
    %c0_i32_1 = arith.constant 0 : i32
    return %arg1, %c0_i32, %c0_i32_0 : i32, i32, i32
  }
  func.func @transform_13(%arg0: i32, %arg1: i32) -> (i32, i32, i32) {
    %c0_i32 = arith.constant 0 : i32
    %c0_i32_0 = arith.constant 0 : i32
    %c0_i32_1 = arith.constant 0 : i32
    return %arg1, %c0_i32, %c0_i32_0 : i32, i32, i32
  }
  func.func @transform_14(%arg0: i32, %arg1: i32) -> (i32, i32, i32) {
    %c0_i32 = arith.constant 0 : i32
    %c0_i32_0 = arith.constant 0 : i32
    %c0_i32_1 = arith.constant 0 : i32
    return %arg0, %c0_i32, %c0_i32_0 : i32, i32, i32
  }
}

</mosaic_0001>

<bundles_post_ra>
// kernel: tpu_custom_call.1
= control target key start
LH: loop header
LB: loop body
LE: loop exit
PB: predicated region body
PF: predicated region fallthrough
CT: control target
= control target key end

     0   :  { %s3732_s0 = inlined_call_operand.hbm [shape: f32[2,8,128], index: 0, kind: input, shape index: {}]   ;;  %s3733_s1 = inlined_call_operand.hbm [shape: f32[1,8,128], index: 1, kind: input, shape index: {}]   ;;  %s3734_s2 = inlined_call_operand.hbm [shape: bf16[2,128,384], index: 2, kind: input, shape index: {}]   ;;  %s3735_s3 = inlined_call_operand.hbm [shape: f32[2,1,384], index: 3, kind: input, shape index: {}]   ;;  %s3736_s4 = inlined_call_operand.hbm [shape: bf16[2,128,128], index: 4, kind: input, shape index: {}]   ;;  %s3737_s5 = inlined_call_operand.vmem [shape: f32[2,1,128], index: 5, kind: input, shape index: {}]   ;;  %s3738_s6 = inlined_call_operand.hbm [shape: bf16[2,128,256], index: 6, kind: input, shape index: {}]   ;;  %s3739_s7 = inlined_call_operand.vmem [shape: f32[2,1,256], index: 7, kind: input, shape index: {}]   ;;  %s3740_s8 = inlined_call_operand.hbm [shape: bf16[2,256,128], index: 8, kind: input, shape index: {}]   ;;  %s3741_s9 = inlined_call_operand.vmem [shape: f32[2,1,128], index: 9, kind: input, shape index: {}]   ;;  %s3742_s10 = inlined_call_operand.hbm [shape: f32[2,1,128], index: 10, kind: input, shape index: {}]   ;;  %s3743_s11 = inlined_call_operand.vmem [shape: f32[2,1,128], index: 11, kind: input, shape index: {}]   ;;  %s3744_s12 = inlined_call_operand.hbm [shape: f32[2,1,128], index: 12, kind: input, shape index: {}]   ;;  %s3745_s13 = inlined_call_operand.vmem [shape: f32[2,1,128], index: 13, kind: input, shape index: {}]   ;;  %s3746_s14 = inlined_call_operand.hbm [shape: f32[2,8,128], index: 14, kind: output, shape index: {}]  }
   0x1   :  { %3765 = sst [smem:[#allocation44_spill]] %s3732_s0 }
   0x2   :  { %3766 = sst [smem:[#allocation45_spill]] %s3733_s1 }
   0x3   :  { %3767 = sst [smem:[#allocation46_spill]] %s3734_s2 }
   0x4   :  { %3768 = sst [smem:[#allocation47_spill]] %s3735_s3 }
   0x5   :  { %3769 = sst [smem:[#allocation48_spill]] %s3736_s4 }
   0x6   :  { %3770 = sst [smem:[#allocation49_spill]] %s3737_s5 }
   0x7   :  { %3771 = sst [smem:[#allocation50_spill]] %s3738_s6 }
   0x8   :  { %3772 = sst [smem:[#allocation51_spill]] %s3739_s7 }
   0x9   :  { %3773 = sst [smem:[#allocation52_spill]] %s3740_s8 }
   0xa   :  { %3774 = sst [smem:[#allocation53_spill]] %s3741_s9 }
   0xb   :  { %3775 = sst [smem:[#allocation54_spill]] %s3742_s10 }
   0xc   :  { %3776 = sst [smem:[#allocation55_spill]] %s3743_s11 }
   0xd   :  { %3777 = sst [smem:[#allocation56_spill]] %s3744_s12 }
   0xe   :  { %3778 = sst [smem:[#allocation57_spill]] %s3745_s13 }
   0xf   :  { %3779 = sst [smem:[#allocation58_spill]] %s3746_s14 }
  0x10   :  { %19 = vsyncpa [#allocation4], 0 }
  0x11   :  { %20 = vsyncpa [#allocation7], 0 }
  0x12   :  { %22 = vsyncpa [#allocation7 + $0x1], 0 }
  0x13   :  { %23 = vsyncpa [#allocation10], 0 }
  0x14   :  { %25 = vsyncpa [#allocation10 + $0x1], 0 }
  0x15   :  { %26 = vsyncpa [#allocation13], 0 }
  0x16   :  { %28 = vsyncpa [#allocation13 + $0x1], 0 }
  0x17   :  { %29 = vsyncpa [#allocation16], 0 }
  0x18   :  { %31 = vsyncpa [#allocation16 + $0x1], 0 }
  0x19   :  { %32 = vsyncpa [#allocation5], 0 }
  0x1a   :  { %34 = vsyncpa [#allocation5 + $0x1], 0  ;;  %s3165_s29 = smov 0   ;;  %s3167_s30 = smov 0  }
  0x1b   :  { %s3169_s15 = smov 0   ;;  %s3171_s16 = smov 0  }
  0x1c   :  { %s3173_s17 = smov 0   ;;  %s3175_s18 = smov 0  }
  0x1d   :  { %s3177_s19 = smov 0   ;;  %s3179_s20 = smov 0  }
  0x1e   :  { %s3181_s21 = smov 0   ;;  %s3183_s22 = smov 0  }
  0x1f   :  { %s3185_s23 = smov 0  }
  0x20 LB: > { %3780 = sst [smem:[#allocation30_spill]] %s3036_s29  ;;  %s49_s24 = sadd.s32 1, %s3068_s21  ;;  %s3076_s23 = sphi %s3185_s23, %s40_s23   ;;  %s3072_s22 = sphi %s3183_s22, %s3841_s22   ;;  %s3068_s21 = sphi %s3181_s21, %s3840_s21   ;;  %s3064_s20 = sphi %s3179_s20, %s3839_s20   ;;  %s3060_s19 = sphi %s3177_s19, %s3838_s19   ;;  %s3056_s18 = sphi %s3175_s18, %s3837_s18   ;;  %s3052_s17 = sphi %s3173_s17, %s3836_s17   ;;  %s3048_s16 = sphi %s3171_s16, %s3835_s16   ;;  %s3044_s15 = sphi %s3169_s15, %s3834_s15   ;;  %s3040_s30 = sphi %s3167_s30, %s3843_s30   ;;  %s3036_s29 = sphi %s3165_s29, %s3842_s29  }
  0x21   : > { %3781 = sst [smem:[#allocation31_spill]] %s3044_s15  ;;  %s80_s25 = sadd.s32 1, %s3056_s18 }
  0x22   : > { %3782 = sst [smem:[#allocation32_spill]] %s3052_s17  ;;  %p3222_p0 = scmp.ge.s32.totalorder %s49_s24, 2 }
  0x23   : > { %3783 = sst [smem:[#allocation33_spill]] %s3056_s18  ;;  %p87_p1 = scmp.ne.s32.totalorder %s3056_s18, %s3052_s17 }
  0x24   : > { %3784 = sst [smem:[#allocation34_spill]] %s3060_s19  ;;  %p88_p2 = scmp.eq.s32.totalorder %s3076_s23, 0 }
  0x25   : > { %3785 = sst [smem:[#allocation35_spill]] %s3064_s20  ;;  %s3845_s24 = smov (%p3222_p0, %s49_s24), 0 }
  0x26   : > { %3786 = sst [smem:[#allocation36_spill]] %s3068_s21  ;;  %p89_p3 = por %p88_p2, %p87_p1 }
  0x27   : > { %3787 = sst [smem:[#allocation37_spill]] %s3072_s22  ;;  %p2537_p4 = scmp.lt.s32.totalorder %s3076_s23, 4 }
  0x28   : > { %3788 = sst [smem:[#allocation38_spill]] %s3076_s23  ;;  %s77_s27 = ssub.s32 %s3068_s21, %s3845_s24 }
  0x29   : > { %3790 = sst [smem:[#allocation39_spill]] %s3845_s24  ;;  %s3237_s28 = sand.u32 1, %s3076_s23  }
  0x2a   : > { %p78_p5 = scmp.eq.s32.totalorder %s77_s27, 0  ;;  %s3240_s14 = sand.u32 1, %s3056_s18  }
  0x2b   : > { %s2481_s0 = smul.u32 192, %s3068_s21  ;;  %s3792_s2 = sld [smem:[#allocation46_spill]] }
  0x2c   : > { %s3244_s20 = scalar_select %p78_p5, %s3056_s18, %s80_s25  }
  0x2d   : > { %s2480_s13 = smul.u32 192, %s3240_s14  ;;  %p3250_p6 = pnand %p2537_p4, %p89_p3 }
  0x2e   : > { %3791 = sst [smem:[#allocation40_spill]] %s3244_s20  ;;  %s3754_s25 = scalar_lea.sflag [#allocation7], %s3237_s28 }
  0x2f   : > { %s445_s27 = scalar_lea.vmem [#allocation6], %s2480_s13  ;;  %s3078_s20 = smov 192  }
  0x30   : > { %s453_s19 = sshll.u32 %s445_s27, 4  ;;  %s3079_s18 = smov 12   ;;  %s454_s19 = int_to_ptr.vmem [resolvable:$true] %s453_s19 }
  0x31   : > { %s450_s7 = scalar_lea.hbm %s3792_s2, %s2481_s0  ;;  %s2120_s0 = sshll.u32 %s3240_s14, 6 }
  0x32   : > { %s451_s5 = sshll.u32 %s450_s7, 4  ;;  %s2413_s7 = sshll.u32 %s3068_s21, 6  ;;  %s452_s5 = int_to_ptr.hbm [resolvable:$true] %s451_s5 }
  0x33   : > { %2513 = dma.hbm_to_vmem [thread:$0]  (!%p3250_p6), %s452_s5, 3072, %s454_s19, %s3754_s25, %s3078_s20, %s3078_s20, %s3079_s18  }
  0x34   : > { %s3794_s4 = sld [smem:[#allocation48_spill]]  ;;  %s486_s13 = scalar_lea.vmem [#allocation9], %s2120_s0 }
  0x35   : > { %s494_s27 = sshll.u32 %s486_s13, 4  ;;  %s3753_s10 = scalar_lea.sflag [#allocation10], %s3237_s28  ;;  %s495_s27 = int_to_ptr.vmem [resolvable:$true] %s494_s27 }
  0x36   : > { %s3080_s3 = smov 64   ;;  %s3081_s1 = smov 4  }
  0x37   : > { %s2123_s5 = sshll.u32 %s3240_s14, 7  ;;  %s2414_s18 = sshll.u32 %s3068_s21, 7 }
  0x38   : > { %s3795_s6 = sld [smem:[#allocation50_spill]]  ;;  %p93_p7 = scmp.ne.s32.totalorder %s3052_s17, %s3048_s16 }
  0x39   : > { %s3796_s8 = sld [smem:[#allocation52_spill]]  ;;  %p402_p11 = scmp.ne.s32.totalorder %s3044_s15, %s3040_s30 }
  0x3a   : > { %s491_s2 = scalar_lea.hbm %s3794_s4, %s2413_s7  ;;  %s514_s7 = scalar_lea.vmem [#allocation11], %s2123_s5 }
  0x3b   : > { %s492_s12 = sshll.u32 %s491_s2, 4  ;;  %s522_s9 = sshll.u32 %s514_s7, 4  ;;  %s493_s12 = int_to_ptr.hbm [resolvable:$true] %s492_s12  ;;  %s3276_s9 = int_to_ptr.vmem [resolvable:$true] %s522_s9 }
  0x3c   : > { %2519 = dma.hbm_to_vmem [thread:$0]  (!%p3250_p6), %s493_s12, 1024, %s495_s27, %s3753_s10, %s3080_s3, %s3080_s3, %s3081_s1  }
  0x3d   : > { %s543_s27 = scalar_lea.vmem [#allocation12], %s2123_s5  ;;  %s3287_s7 = sadd.s32 4294967295, %s3076_s23  }
  0x3e   : > { %s519_s2 = scalar_lea.hbm %s3795_s6, %s2414_s18  ;;  %s551_s19 = sshll.u32 %s543_s27, 4  ;;  %s552_s19 = int_to_ptr.vmem [resolvable:$true] %s551_s19 }
  0x3f   : > { %s520_s0 = sshll.u32 %s519_s2, 4  ;;  %s548_s13 = scalar_lea.hbm %s3796_s8, %s2414_s18  ;;  %s3274_s0 = int_to_ptr.hbm [resolvable:$true] %s520_s0 }
  0x40   : > { %s549_s20 = sshll.u32 %s548_s13, 4  ;;  %s3752_s2 = scalar_lea.sflag [#allocation13], %s3237_s28  ;;  %s550_s20 = int_to_ptr.hbm [resolvable:$true] %s549_s20 }
  0x41   : > { %2525 = dma.hbm_to_vmem [thread:$0]  (!%p3250_p6), %s550_s20, 2048, %s552_s19, %s3752_s2, %s3080_s3, %s3080_s3, %s3081_s1  }
  0x42   : > { %s2115_s18 = sadd.s32 4294967294, %s3076_s23   ;;  %s52_s5 = sadd.s32 1, %s3072_s22 }
  0x43   : > { %s3847_s5 = smov (!%p3222_p0, %s52_s5), %s3072_s22  ;;  %p94_p8 = scmp.eq.s32.totalorder %s3287_s7, 0 }
  0x44   : > { %p54_p9 = scmp.ge.s32.totalorder %s3847_s5, 2  ;;  %s392_s12 = sadd.s32 1, %s3044_s15 }
  0x45   : > { %p3300_p10 = por %p94_p8, %p93_p7  ;;  %p403_p12 = scmp.eq.s32.totalorder %s3287_s7, 3 }
  0x46   : > { %s3849_s5 = smov (%p54_p9, %s3847_s5), 0  ;;  %p408_p13 = scmp.ne.s32.totalorder %s3040_s30, %s3036_s29 }
  0x47   : > { %3798 = sst [smem:[#allocation41_spill]] %s3849_s5  ;;  %s389_s1 = ssub.s32 %s3072_s22, %s3849_s5 }
  0x48   : > { %p409_p0 = scmp.eq.s32.totalorder %s2115_s18, 3  ;;  %p390_p1 = scmp.eq.s32.totalorder %s389_s1, 0 }
  0x49   : > { %p3313_p2 = por %p403_p12, %p402_p11  ;;  %p2116_p4 = scmp.ge.s32.totalorder %s3076_s23, 1 }
  0x4a   : > { %p3317_p3 = por %p409_p0, %p408_p13  ;;  %p416_p5 = scmp.lt.s32.totalorder %s3076_s23, 5 }
  0x4b   : > { %s3323_s26 = scalar_select %p390_p1, %s3044_s15, %s392_s12  }
  0x4c   : > { %s3800_s16 = scalar_select %p3317_p3, 1, 0 }
  0x4d   : > { %3802 = sst [smem:[#allocation43_spill]] %s3323_s26  ;;  %p3329_p7 = pnand %p2116_p4, %p416_p5 }
  0x4e   : > { %3801 = sst [smem:[#allocation42_spill]] %s3800_s16  ;;  %s3082_s1 = smov [#allocation3]  }
  0x4f   : > { %s3803_s19 = sld [smem:[#allocation45_spill]]  ;;  %s430_s2 = sshll.u32 %s3082_s1, 4  ;;  %s431_s2 = int_to_ptr.vmem [resolvable:$true] %s430_s2 }
  0x50   : > { %s2482_s12 = smul.u32 3, %s3240_s14  ;;  %p2506_p9 = pneg %p3329_p7 }
  0x51   : > { %s2483_s13 = smul.u32 3, %s3068_s21  ;;  %s3805_s4 = sld [smem:[#allocation47_spill]] }
  0x52   : > { %p2507_p11 = pnand %p2506_p9, %p94_p8  ;;  %s467_s27 = scalar_lea.vmem [#allocation8], %s2482_s12 }
  0x53   : > { %s3806_s8 = scalar_lea.sflag [#allocation7], %s3237_s28  ;;  %s3083_s5 = smov 128  }
  0x54   : > { %s3084_s22 = smov 8   ;;  %s3807_s12 = scalar_lea.sflag [#allocation10], %s3237_s28 }
  0x55   : > { %s428_s20 = sshll.u32 %s3803_s19, 4  ;;  %s475_s19 = sshll.u32 %s467_s27, 4  ;;  %s429_s20 = int_to_ptr.hbm [resolvable:$true] %s428_s20  ;;  %s476_s19 = int_to_ptr.vmem [resolvable:$true] %s475_s19 }
  0x56   : > { %2509 = dma.hbm_to_vmem [thread:$0]  (!%p2507_p11), %s429_s20, 128, %s431_s2, [#allocation4]  }
  0x57   : > { %s471_s1 = scalar_lea.hbm %s3805_s4, %s2483_s13  ;;  %s3808_s27 = sld [smem:[#allocation54_spill]] }
  0x58   : > { %s473_s6 = sshll.u32 %s471_s1, 4  ;;  %s570_s13 = scalar_lea.vmem [#allocation14], %s3240_s14  ;;  %s474_s6 = int_to_ptr.hbm [resolvable:$true] %s473_s6 }
  0x59   : > { %2516 = dma.hbm_to_vmem [thread:$0]  (!%p3250_p6), %s474_s6, 48, %s476_s19, %s3806_s8  }
  0x5a   : > { %2522 = dma.hbm_to_vmem [thread:$0]  (!%p3250_p6), %s3274_s0, 2048, %s3276_s9, %s3807_s12, %s3083_s5, %s3083_s5, %s3084_s22  }
  0x5b   : > { %s577_s26 = sshll.u32 %s570_s13, 4  ;;  %s3809_s2 = scalar_lea.sflag [#allocation13], %s3237_s28  ;;  %s578_s26 = int_to_ptr.vmem [resolvable:$true] %s577_s26 }
  0x5c   : > { %s3810_s20 = sld [smem:[#allocation56_spill]]  ;;  %s593_s16 = scalar_lea.vmem [#allocation15], %s3240_s14 }
  0x5d   : > { %s573_s4 = scalar_lea.hbm %s3808_s27, %s3068_s21  ;;  %s600_s29 = sshll.u32 %s593_s16, 4  ;;  %s601_s29 = int_to_ptr.vmem [resolvable:$true] %s600_s29 }
  0x5e   : > { %s575_s1 = sshll.u32 %s573_s4, 4  ;;  %s591_s22 = scalar_lea.sflag [#allocation16], %s3240_s14  ;;  %s576_s1 = int_to_ptr.hbm [resolvable:$true] %s575_s1 }
  0x5f   : > { %2528 = dma.hbm_to_vmem [thread:$0]  (!%p3250_p6), %s576_s1, 16, %s578_s26, %s3809_s2  }
  0x60   : > { %615 = sbr.rel (%p3329_p7) target bundleno = 2091 (0x82b), region = 72 }
  0x62   : > { %s596_s19 = scalar_lea.hbm %s3810_s20, %s3068_s21 }
  0x63   : > { %s598_s15 = sshll.u32 %s596_s19, 4  ;;  %s599_s15 = int_to_ptr.hbm [resolvable:$true] %s598_s15 }
  0x64   : > { %2531 = dma.hbm_to_vmem [thread:$0]  (!%p3250_p6), %s599_s15, 16, %s601_s29, %s591_s22  }
  0x65   : > { %3009 = dma.done.wait (%p94_p8), [#allocation4], 128  }
  0x66   : > { %3011 = vsyncadd (%p94_p8), [#allocation4], 4294967168  ;;  %s622_s28 = sand.u32 1, %s3287_s7   ;;  %s3377_s0 = sand.u32 1, %s3052_s17  }
  0x67   : > { %s2484_s9 = smul.u32 192, %s3377_s0  ;;  %s623_s14 = scalar_lea.sflag [#allocation7], %s622_s28 }
  0x69   : > { %s3380_s24 = scalar_lea.vmem [#allocation6], %s2484_s9 }
  0x6a   : > { %3013 = dma.done.wait (%p3300_p10), %s623_s14, 3120  }
  0x6b   : > { %3015 = vsyncadd (%p3300_p10), %s623_s14, 4294964176  ;;  %s2485_s29 = smul.u32 3, %s3377_s0  ;;  %s2131_s15 = sshll.u32 %s3377_s0, 6 }
  0x6c   : > { %s643_s7 = scalar_lea.sflag [#allocation10], %s622_s28  ;;  %s3390_s16 = scalar_lea.vmem [#allocation9], %s2131_s15 }
  0x6d   : > { %s3388_s5 = scalar_lea.vmem [#allocation8], %s2485_s29 }
  0x6e   : > { %3017 = dma.done.wait (%p3300_p10), %s643_s7, 3072  }
  0x6f   : > { %3019 = vsyncadd (%p3300_p10), %s643_s7, 4294964224  ;;  %s2132_s26 = sshll.u32 %s3377_s0, 7  ;;  %s663_s12 = scalar_lea.sflag [#allocation13], %s622_s28 }
  0x70   : > { %s3397_s18 = scalar_lea.vmem [#allocation11], %s2132_s26  ;;  %s3399_s10 = scalar_lea.vmem [#allocation12], %s2132_s26 }
  0x71   : > { %3021 = dma.done.wait (%p3300_p10), %s663_s12, 2064  }
  0x72   : > { %3023 = vsyncadd (%p3300_p10), %s663_s12, 4294965232  ;;  %s682_s27 = scalar_lea.sflag [#allocation16], %s3377_s0 }
  0x73   : > { %3025 = dma.done.wait (%p3300_p10), %s682_s27, 16  }
  0x74   : > { %3027 = vsyncadd (%p3300_p10), %s682_s27, 4294967280  ;;  %s3811_s13 = sld [smem:[#allocation34_spill]]  ;;  %s3760_s1 = sand.u32 1, %s3040_s30  }
  0x75   : > { %s3416_s2 = sshll.u32 %s3760_s1, 3  ;;  %s3813_s14 = sld [smem:[#allocation51_spill]] }
  0x76   : > { %s3814_s26 = sld [smem:[#allocation53_spill]]  ;;  %s771_s23 = scalar_lea.vmem [#allocation17], %s3416_s2 }
  0x77   : > { %s3815_s4 = sld [smem:[#allocation55_spill]] }
  0x78   : > { %s3816_s21 = sld [smem:[#allocation57_spill]] }
  0x7a   : > { %p772_p6 = scmp.lt.s32.totalorder %s3811_s13, 1  ;;  %p2136_p8 = scmp.ne.s32.totalorder %s3811_s13, 0 }
  0x7c   : > { %s3419_s6 = scalar_select %p772_p6, %s3811_s13, 1 }
  0x7d   : > { %791 = sbr.rel (%p2136_p8) target bundleno = 154 (0x9a), region = 108 }
  0x7e   : > { %s2135_s22 = sshll.u32 %s3419_s6, 1  ;;  %s781_s12 = scalar_lea.vmem %s3814_s26, %s3419_s6 }
  0x7f   : > { %s3429_s29 = scalar_lea.vmem %s3813_s14, %s2135_s22  ;;  %s784_s25 = scalar_lea.vmem %s3815_s4, %s3419_s6 }
  0x80   : > { %s787_s17 = scalar_lea.vmem %s3816_s21, %s3419_s6 }
  0x82   : > { %s3817_s19 = sld [smem:[#allocation35_spill]]  ;;  %s3085_s15 = smov [#allocation2]  }
  0x83   : > { %s3818_s14 = sld [smem:[#allocation44_spill]]  ;;  %s803_s7 = sshll.u32 %s3085_s15, 4  ;;  %s804_s7 = int_to_ptr.vmem [resolvable:$true] %s803_s7 }
  0x88   : > { %s2137_s28 = sshll.u32 %s3817_s19, 3 }
  0x89   : > { %s793_s11 = scalar_lea.hbm %s3818_s14, %s2137_s28  ;;  %s2916_s13 = scalar_lea.hbm %s3818_s14, 16 }
  0x8a   : > { %s801_s26 = sshll.u32 %s793_s11, 4  ;;  %s802_s26 = int_to_ptr.hbm [resolvable:$true] %s801_s26 }
  0x8b   : > { %s2912_s4 = sshra.s32 %s802_s26, 4  ;;  %s2913_s4 = int_to_ptr.hbm [resolvable:$true] %s2912_s4 }
  0x8c   : > { %s2914_s1 = scalar_lea.hbm %s2913_s4, 8  ;;  %p2917_p12 = scmp.lt.s32.totalorder %s2913_s4, %s3818_s14 }
  0x8d   : > { %p2915_p10 = scmp.ne.s32.totalorder %s2913_s4, %s2914_s1  ;;  %p2918_p13 = scmp.lt.s32.totalorder %s2916_s13, %s2914_s1 }
  0x8f   : > { %p2919_p0 = por %p2918_p13, %p2917_p12 }
  0x91   : > { %p2920_p1 = pnand %p2919_p0, %p2915_p10 }
  0x93   : > { %2923 = shalt.err (!%p2920_p1)  }
  0x94   : > { %806 = dma.hbm_to_vmem [thread:$0]  %s802_s26, 128, %s804_s7, [#allocation18] }
  0x95   : > { %3028 = dma.done.wait [#allocation18], 128 }
  0x96   : > { %3029 = vsyncadd [#allocation18], 4294967168  ;;  %v811_v0 = vld [vmem:[#allocation2] sm:$0xff]  ;;  %v812_v1 = vld [vmem:[#allocation3] sm:$0xff] }
  0x97   : > { %v813_v2 = vadd.f32 %v812_v1, %v811_v0 }
  0x99   : > { %814 = vst [vmem:[#allocation2] sm:$0xff] %v813_v2 }
  0x9a PF: > { %v3086_v4 = vmov 128.0   ;;  %v2224_v5 = vld [vmem:[%s3380_s24 + $0xa8] sm:$0xf]  ;;  %v2438_v6 = vld [vmem:[%s3380_s24 + $0xb0] sm:$0xf0]  ;;  %vm1086_vm4 = vcmask 261120  }
  0x9b   : > { %2646 = vrcp.f32 %v3086_v4  ;;  %v2437_v7 = vld [vmem:[%s3380_s24 + $0xac] sm:$0xf]  ;;  %v2225_v8 = vor.u32 %v2438_v6, %v2224_v5  ;;  %v2226_v9 = vld [vmem:[%s3380_s24 + $0xb4] sm:$0xf0]  ;;  %v2232_v10 = vld [vmem:[%s3380_s24 + $0xb0] sm:$0xf] }
  0x9c   : > { %v2439_v11 = vld [vmem:[%s3380_s24 + $0xb8] sm:$0xf0]  ;;  %v2229_v12 = vor.u32 %v2437_v7, %v2226_v9  ;;  %v2212_v24 = vld [vmem:[%s3380_s24 + $0x90] sm:$0xf]  ;;  %v2434_v26 = vld [vmem:[%s3380_s24 + $0x94] sm:$0xf] }
  0x9d   : > { %v2233_v13 = vor.u32 %v2439_v11, %v2232_v10  ;;  %1022 = vmatpush.bf16.msra.mxu0 %v2225_v8  ;;  %v2435_v25 = vld [vmem:[%s3380_s24 + $0x98] sm:$0xf0]  ;;  %v2214_v28 = vld [vmem:[%s3380_s24 + $0x9c] sm:$0xf0]  ;;  %v2220_v29 = vld [vmem:[%s3380_s24 + $0x98] sm:$0xf] }
  0x9e   : > { %1035 = vmatpush.bf16.msra.mxu1 %v2229_v12  ;;  %v2213_v27 = vor.u32 %v2435_v25, %v2212_v24  ;;  %v2436_v30 = vld [vmem:[%s3380_s24 + $0xa0] sm:$0xf0]  ;;  %v2217_v31 = vor.u32 %v2434_v26, %v2214_v28  ;;  %v2200_v33 = vld [vmem:[%s3380_s24 + $0x78] sm:$0xf]  ;;  %v2431_v35 = vld [vmem:[%s3380_s24 + $0x7c] sm:$0xf] }
  0x9f   : > { %1048 = vmatpush.bf16.msra.mxu2 %v2233_v13  ;;  %v2221_v32 = vor.u32 %v2436_v30, %v2220_v29  ;;  %v2432_v34 = vld [vmem:[%s3380_s24 + $0x80] sm:$0xf0]  ;;  %v2202_v37 = vld [vmem:[%s3380_s24 + $0x84] sm:$0xf0]  ;;  %v2208_v38 = vld [vmem:[%s3380_s24 + $0x80] sm:$0xf] }
  0xa0   : > { %v3455_v3 = vld [vmem:[#allocation2] sm:$0xff]  ;;  %v2201_v36 = vor.u32 %v2432_v34, %v2200_v33  ;;  %v2433_v39 = vld [vmem:[%s3380_s24 + $0x88] sm:$0xf0]  ;;  %v2205_v40 = vor.u32 %v2431_v35, %v2202_v37  ;;  %v2188_v42 = vld [vmem:[%s3380_s24 + $0x60] sm:$0xf]  ;;  %s3087_s22 = smov 32  }
  0xa1   : > { %818 = vadd.xlane.f32.xlu0 %v3455_v3  ;;  %v2647_v14 = vpop.eup %2646  ;;  %1023 = vmatpush.bf16.msra.mxu0 %v2213_v27  ;;  %v2209_v41 = vor.u32 %v2433_v39, %v2208_v38  ;;  %v2429_v43 = vld [vmem:[%s3380_s24 + $0x68] sm:$0xf0]  ;;  %v2428_v44 = vld [vmem:[%s3380_s24 + $0x64] sm:$0xf]  ;;  %v2190_v46 = vld [vmem:[%s3380_s24 + $0x6c] sm:$0xf0] }
  0xa2   : > { %v821_v15 = vmul.f32 128.0, %v2647_v14  ;;  %vm825_vm0 = vweird.f32 %v2647_v14  ;;  %1036 = vmatpush.bf16.msra.mxu1 %v2217_v31  ;;  %v2189_v45 = vor.u32 %v2429_v43, %v2188_v42  ;;  %v2196_v47 = vld [vmem:[%s3380_s24 + $0x68] sm:$0xf]  ;;  %v2430_v48 = vld [vmem:[%s3380_s24 + $0x70] sm:$0xf0]  ;;  %v2193_v49 = vor.u32 %v2428_v44, %v2190_v46  ;;  %s3088_s9 = smov 64  }
  0xa3   : > { %1049 = vmatpush.bf16.msra.mxu2 %v2221_v32  ;;  %v2197_v50 = vor.u32 %v2430_v48, %v2196_v47  ;;  %v2176_v51 = vld [vmem:[%s3380_s24 + $0x48] sm:$0xf]  ;;  %v2426_v52 = vld [vmem:[%s3380_s24 + $0x50] sm:$0xf0]  ;;  %v2425_v53 = vld [vmem:[%s3380_s24 + $0x4c] sm:$0xf] }
  0xa4   : > { %v822_v16 = vsub.f32 1.0, %v821_v15  ;;  %v2177_v54 = vor.u32 %v2426_v52, %v2176_v51  ;;  %v2178_v55 = vld [vmem:[%s3380_s24 + $0x54] sm:$0xf0]  ;;  %v2184_v56 = vld [vmem:[%s3380_s24 + $0x50] sm:$0xf]  ;;  %vm1183_vm5 = vcmask 64512  }
  0xa5   : > { %1024 = vmatpush.bf16.msra.mxu0 %v2201_v36  ;;  %v2427_v57 = vld [vmem:[%s3380_s24 + $0x58] sm:$0xf0]  ;;  %v2181_v58 = vor.u32 %v2425_v53, %v2178_v55  ;;  %v2164_v60 = vld [vmem:[%s3380_s24 + $0x30] sm:$0xf]  ;;  %v2422_v62 = vld [vmem:[%s3380_s24 + $0x34] sm:$0xf] }
  0xa6   : > { %v823_v17 = vmul.f32 %v2647_v14, %v822_v16  ;;  %1037 = vmatpush.bf16.msra.mxu1 %v2205_v40  ;;  %v2185_v59 = vor.u32 %v2427_v57, %v2184_v56  ;;  %v2423_v61 = vld [vmem:[%s3380_s24 + $0x38] sm:$0xf0]  ;;  %v2166_v0 = vld [vmem:[%s3380_s24 + $0x3c] sm:$0xf0]  ;;  %v2172_v1 = vld [vmem:[%s3380_s24 + $0x38] sm:$0xf] }
  0xa7   : > { %1050 = vmatpush.bf16.msra.mxu2 %v2209_v41  ;;  %v2165_v63 = vor.u32 %v2423_v61, %v2164_v60  ;;  %v2424_v2 = vld [vmem:[%s3380_s24 + $0x40] sm:$0xf0]  ;;  %v2169_v4 = vor.u32 %v2422_v62, %v2166_v0  ;;  %v2152_v6 = vld [vmem:[%s3380_s24 + $0x18] sm:$0xf]  ;;  %v2419_v8 = vld [vmem:[%s3380_s24 + $0x1c] sm:$0xf] }
  0xa8   : > { %v824_v18 = vadd.f32 %v2647_v14, %v823_v17  ;;  %v2173_v5 = vor.u32 %v2424_v2, %v2172_v1  ;;  %v2420_v7 = vld [vmem:[%s3380_s24 + $0x20] sm:$0xf0]  ;;  %v2154_v10 = vld [vmem:[%s3380_s24 + $0x24] sm:$0xf0]  ;;  %v2160_v11 = vld [vmem:[%s3380_s24 + $0x20] sm:$0xf] }
  0xa9   : > { %1025 = vmatpush.bf16.msra.mxu0 %v2189_v45  ;;  %v2153_v9 = vor.u32 %v2420_v7, %v2152_v6  ;;  %v2421_v12 = vld [vmem:[%s3380_s24 + $0x28] sm:$0xf0]  ;;  %v2157_v13 = vor.u32 %v2419_v8, %v2154_v10  ;;  %v2140_v15 = vld [vmem:[%s3380_s24] sm:$0xf]  ;;  %v2416_v17 = vld [vmem:[%s3380_s24 + $0x4] sm:$0xf] }
  0xaa   : > { %v3464_v19 = vsel %vm825_vm0, %v2647_v14, %v824_v18  ;;  %1038 = vmatpush.bf16.msra.mxu1 %v2193_v49  ;;  %v2161_v14 = vor.u32 %v2421_v12, %v2160_v11  ;;  %v2417_v16 = vld [vmem:[%s3380_s24 + $0x8] sm:$0xf0]  ;;  %v2641_v38 = vld [vmem:[%s784_s25] ss:$0 sm:$0xff]  ;;  %v886_v42 = vld [vmem:[%s3388_s5] sm:$0x7] }
  0xab   : > { %1051 = vmatpush.bf16.msra.mxu2 %v2197_v50  ;;  %v2141_v18 = vor.u32 %v2417_v16, %v2140_v15  ;;  %v888_v43 = vperm.slane %v886_v42, 0  ;;  %v889_v44 = vperm.slane %v886_v42, 1  ;;  %s3089_s25 = smov 96   ;;  %v890_v57 = vperm.slane %v886_v42, 2  ;;  %s3821_s7 = sld [smem:[#allocation49_spill]] }
  0xac   : > { %vm1333_vm6 = vcmask 523264   ;;  %vm1335_vm7 = vcmask 785408  }
  0xad   : > { %1026 = vmatpush.bf16.msra.mxu0 %v2177_v54 }
  0xae   : > { %1039 = vmatpush.bf16.msra.mxu1 %v2181_v58 }
  0xaf   : > { %1052 = vmatpush.bf16.msra.mxu2 %v2185_v59 }
  0xb1   : > { %1027 = vmatpush.bf16.msra.mxu0 %v2165_v63 }
  0xb2   : > { %1040 = vmatpush.bf16.msra.mxu1 %v2169_v4 }
  0xb3   : > { %1053 = vmatpush.bf16.msra.mxu2 %v2173_v5 }
  0xb5   : > { %1028 = vmatpush.bf16.msra.mxu0 %v2153_v9 }
  0xb6   : > { %1041 = vmatpush.bf16.msra.mxu1 %v2157_v13 }
  0xb7   : > { %1054 = vmatpush.bf16.msra.mxu2 %v2161_v14 }
  0xb9   : > { %1029 = vmatpush.bf16.msra.mxu0 %v2141_v18 }
 0x114   : > { %v819_v20 = vpop.xlane.xlu0 %818 }
 0x115   : > { %v827_v21 = vmul.f32 %v3464_v19, %v819_v20  ;;  %v2142_v20 = vld [vmem:[%s3380_s24 + $0xc] sm:$0xf0] }
 0x116   : > { %v2145_v24 = vor.u32 %v2416_v17, %v2142_v20 }
 0x117   : > { %v3468_v22 = vsub.f32 %v3455_v3, %v827_v21  ;;  %v2148_v21 = vld [vmem:[%s3380_s24 + $0x8] sm:$0xf] }
 0x118   : > { %1042 = vmatpush.bf16.msra.mxu1 %v2145_v24 }
 0x119   : > { %v829_v23 = vmul.f32 %v3468_v22, %v3468_v22 }
 0x11b   : > { %830 = vadd.xlane.f32.xlu0 %v829_v23  ;;  %v2418_v23 = vld [vmem:[%s3380_s24 + $0x10] sm:$0xf0]  ;;  %s3819_s24 = scalar_lea.vmem [#allocation14], %s3377_s0 }
 0x11c   : > { %v2149_v25 = vor.u32 %v2418_v23, %v2148_v21  ;;  %v2640_v35 = vld [vmem:[%s3819_s24] ss:$0 sm:$0xff] }
 0x11e   : > { %1055 = vmatpush.bf16.msra.mxu2 %v2149_v25 }
 0x18e   : > { %v831_v26 = vpop.xlane.xlu0 %830 }
 0x18f   : > { %v832_v27 = vmul.f32 %v831_v26, %v3464_v19 }
 0x191   : > { %v833_v28 = vadd.f32 1e-05, %v832_v27 }
 0x193   : > { %2648 = vrsqrt.f32 %v833_v28  ;;  %vm840_vm2 = vweird.f32 %v833_v28 }
 0x199   : > { %v2649_v29 = vpop.eup %2648 }
 0x19a   : > { %v835_v30 = vmul.f32 %v2649_v29, %v833_v28  ;;  %vm841_vm1 = vweird.f32 %v2649_v29 }
 0x19b   : > { %vm842_vm3 = vmor %vm840_vm2, %vm841_vm1 }
 0x19c   : > { %v836_v31 = vmul.f32 %v2649_v29, %v835_v30 }
 0x19e   : > { %v837_v32 = vmul.f32 0.5, %v836_v31 }
 0x1a0   : > { %v838_v33 = vsub.f32 1.5, %v837_v32 }
 0x1a2   : > { %v839_v34 = vmul.f32 %v2649_v29, %v838_v33 }
 0x1a4   : > { %v843_v36 = vsel %vm842_vm3, %v2649_v29, %v839_v34 }
 0x1a5   : > { %v844_v37 = vmul.f32 %v843_v36, %v3468_v22 }
 0x1a7   : > { %v848_v39 = vmul.f32 %v2640_v35, %v844_v37 }
 0x1a9   : > { %v852_v40 = vadd.f32 %v2641_v38, %v848_v39 }
 0x1ab   : > { %v853_v41 = vpack.c.bf16 %v852_v40, %v852_v40 }
 0x1ad   : > { %1030 = vmatmul.bf16.vlgmr.msra.gmra.mxu0 %v853_v41  ;;  %1043 = vmatmul.bf16.vlgmr.msra.gmra.mxu1 %v853_v41 }
 0x1ae   : > { %1056 = vmatmul.bf16.vlgmr.msra.gmra.mxu2 %v853_v41 }
 0x22a   : > { %v1031_v45 = vpop.f32.mrf.mxu0  ;;  %v1044_v46 = vpop.f32.mrf.mxu1 }
 0x22b   : > { %v1032_v47 = vadd.f32 %v1031_v45, %v888_v43  ;;  %v1045_v48 = vadd.f32 %v1044_v46, %v889_v44 }
 0x22d   : > { %v1061_v22 = vmul.f32 0.17677669, %v1032_v47  ;;  %1074 = vrot.lane.b32.xlu0 %v1045_v48, %s3087_s22  ;;  %1072 = vrot.lane.b32.xlu2 %v1045_v48, %s3088_s9  ;;  %v2447_v47 = vld [vmem:[%s3390_s16 + $0x38] sm:$0xff] }
 0x22e   : > { %1070 = vrot.lane.b32.xlu1 %v1045_v48, %s3089_s25  ;;  %2234 = vmatpush.xpose.msk.msra.mxu3 %vm1086_vm4, %v1045_v48  ;;  %v2446_v48 = vld [vmem:[%s3390_s16 + $0x30] sm:$0xff] }
 0x22f   : > { %1406 = vmatpush.bf16.msrb.mxu2 %v2447_v47 }
 0x231   : > { %v1057_v49 = vpop.f32.mrf.mxu2  ;;  %2235 = vmatmul.msk.f32.vlgmr.msra.gmra.mxu3 %vm1086_vm4, %v1061_v22 }
 0x232   : > { %v1033_v50 = vpop.f32.mrf.mxu0  ;;  %v1046_v51 = vpop.f32.mrf.mxu1  ;;  %v1058_v58 = vadd.f32 %v1057_v49, %v890_v57  ;;  %v2444_v49 = vld [vmem:[%s3390_s16 + $0x20] sm:$0xff] }
 0x233   : > { %1407 = vmatpush.bf16.msrb.mxu2 %v2446_v48  ;;  %v2443_v50 = vld [vmem:[%s3390_s16 + $0x18] sm:$0xff]  ;;  %v2442_v51 = vld [vmem:[%s3390_s16 + $0x10] sm:$0xff] }
 0x234   : > { %v2290_v48 = vld [vmem:[%s3397_s18 + $0x18] sm:$0xf0] }
 0x235   : > { %1065 = vrot.lane.b32.xlu2 %v1061_v22, %s3088_s9 }
 0x236   : > { %1063 = vrot.lane.b32.xlu1 %v1061_v22, %s3089_s25 }
 0x239   : > { %v1059_v52 = vpop.f32.mrf.mxu2 }
 0x23a   : > { %v2441_v52 = vld [vmem:[%s3390_s16 + $0x8] sm:$0xff] }
 0x23e   : > { %1067 = vrot.lane.b32.xlu1 %v1061_v22, %s3087_s22  ;;  %v2445_v22 = vld [vmem:[%s3390_s16 + $0x28] sm:$0xff] }
 0x23f   : > { %1408 = vmatpush.bf16.msrb.mxu2 %v2445_v22  ;;  %v2280_v22 = vld [vmem:[%s3397_s18] sm:$0xf] }
 0x243   : > { %1409 = vmatpush.bf16.msrb.mxu2 %v2444_v49  ;;  %v2449_v49 = vld [vmem:[%s3397_s18 + $0x4] sm:$0xf0] }
 0x247   : > { %1410 = vmatpush.bf16.msrb.mxu2 %v2443_v50 }
 0x24b   : > { %1411 = vmatpush.bf16.msrb.mxu2 %v2442_v51  ;;  %v2448_v51 = vld [vmem:[%s3397_s18 + $0x4] sm:$0xf] }
 0x24f   : > { %1412 = vmatpush.bf16.msrb.mxu2 %v2441_v52  ;;  %v2282_v52 = vld [vmem:[%s3397_s18 + $0x8] sm:$0xf0] }
 0x287   : > { %v1073_v54 = vpop.permute.xlu2 %1072 }
 0x28f   : > { %v1066_v59 = vpop.permute.xlu2 %1065 }
 0x29f   : > { %v1075_v56 = vpop.permute.xlu0 %1074 }
 0x2a0   : > { %v1071_v53 = vpop.permute.xlu1 %1070 }
 0x2a1   : > { %2236 = vmatpush.xpose.msk.msrb.mxu3 %vm1086_vm4, %v1071_v53  ;;  %v2440_v53 = vld [vmem:[%s3390_s16] sm:$0xff]  ;;  %s3822_s16 = scalar_lea.vmem %s3821_s7, %s3419_s6 }
 0x2a2   : > { %1413 = vmatpush.bf16.msrb.mxu2 %v2440_v53  ;;  %v2281_v53 = vor.u32 %v2449_v49, %v2280_v22  ;;  %v2466_v49 = vld [vmem:[%s3399_s10 + $0x10] sm:$0xff] }
 0x2a5   : > { %2238 = vmatpush.xpose.msk.msra.mxu3 %vm1086_vm4, %v1073_v54 }
 0x2a8   : > { %v1064_v55 = vpop.permute.xlu1 %1063 }
 0x2a9   : > { %2237 = vmatmul.msk.f32.vlgmr.msrb.gmra.mxu3 %vm1086_vm4, %v1064_v55 }
 0x2aa   : > { %2240 = vmatpush.xpose.msk.msrb.mxu3 %vm1086_vm4, %v1075_v56 }
 0x2b0   : > { %v1068_v62 = vpop.permute.xlu1 %1067 }
 0x2b1   : > { %2239 = vmatmul.msk.f32.vlgmr.msra.gmra.mxu3 %vm1086_vm4, %v1066_v59 }
 0x2b2   : > { %1246 = vmatpush.msra.mxu3 %v1058_v58 }
 0x2b4   : > { %v1108_v60 = vpop.f32.mrf.mxu3 }
 0x2b5   : > { %v1184_v61 = vsel %vm1183_vm5, %v1108_v60, -inf }
 0x2b6   : > { %1185 = vmax.xlane.f32.xlu2 %v1184_v61  ;;  %v2642_v61 = vld [vmem:[%s3822_s16] ss:$0 sm:$0xff] }
 0x2b9   : > { %2241 = vmatmul.msk.f32.vlgmr.msrb.gmra.mxu3 %vm1086_vm4, %v1068_v62 }
 0x329   : > { %v1186_v1 = vpop.xlane.xlu2 %1185 }
 0x32a   : > { %v1196_v2 = vsub.f32 %v1108_v60, %v1186_v1 }
 0x32c   : > { %v1132_v63 = vpop.f32.mrf.mxu3  ;;  %v1200_v6 = vmul.f32 1.442695, %v1196_v2  ;;  %v2336_v2 = vld [vmem:[%s3397_s18 + $0x70] sm:$0xf] }
 0x32d   : > { %v1187_v0 = vsel %vm1183_vm5, %v1132_v63, -inf }
 0x32e   : > { %1188 = vmax.xlane.f32.xlu1 %v1187_v0  ;;  %2650 = vpow2.f32 %v1200_v6 }
 0x334   : > { %v1156_v4 = vpop.f32.mrf.mxu3  ;;  %v2651_v9 = vpop.eup %2650 }
 0x335   : > { %v1190_v5 = vsel %vm1183_vm5, %v1156_v4, -inf  ;;  %v1208_v10 = vsel %vm1183_vm5, %v2651_v9, 0.0 }
 0x336   : > { %1191 = vmax.xlane.f32.xlu0 %v1190_v5  ;;  %v2462_v5 = vld [vmem:[%s3397_s18 + $0x74] sm:$0xf] }
 0x33c   : > { %v1180_v7 = vpop.f32.mrf.mxu3 }
 0x33d   : > { %v1193_v8 = vsel %vm1183_vm5, %v1180_v7, -inf }
 0x33e   : > { %1194 = vmax.xlane.f32.xlu2 %v1193_v8 }
 0x346   : > { %1209 = vadd.xlane.f32.xlu2 %v1208_v10 }
 0x34a   : > { %1077 = vrot.lane.b32.xlu0 %v1058_v58, %s3089_s25 }
 0x3a1   : > { %v1189_v11 = vpop.xlane.xlu1 %1188 }
 0x3a2   : > { %v1197_v12 = vsub.f32 %v1132_v63, %v1189_v11 }
 0x3a4   : > { %v1202_v13 = vmul.f32 1.442695, %v1197_v12  ;;  %v2328_v12 = vld [vmem:[%s3397_s18 + $0x60] sm:$0xf] }
 0x3a6   : > { %2652 = vpow2.f32 %v1202_v13  ;;  %v2461_v13 = vld [vmem:[%s3397_s18 + $0x64] sm:$0xf0] }
 0x3a9   : > { %v1192_v14 = vpop.xlane.xlu0 %1191 }
 0x3aa   : > { %v1198_v15 = vsub.f32 %v1156_v4, %v1192_v14  ;;  %v2463_v4 = vld [vmem:[%s3397_s18 + $0x74] sm:$0xf0]  ;;  %v2460_v14 = vld [vmem:[%s3397_s18 + $0x64] sm:$0xf] }
 0x3ab   : > { %v2337_v6 = vor.u32 %v2463_v4, %v2336_v2  ;;  %v2644_v4 = vld [vmem:[%s787_s17] ss:$0 sm:$0xff] }
 0x3ac   : > { %v2653_v16 = vpop.eup %2652  ;;  %v1204_v17 = vmul.f32 1.442695, %v1198_v15  ;;  %v2329_v15 = vor.u32 %v2461_v13, %v2328_v12 }
 0x3ad   : > { %v1211_v18 = vsel %vm1183_vm5, %v2653_v16, 0.0 }
 0x3ae   : > { %2654 = vpow2.f32 %v1204_v17  ;;  %1212 = vadd.xlane.f32.xlu1 %v1211_v18  ;;  %v2320_v18 = vld [vmem:[%s3397_s18 + $0x50] sm:$0xf] }
 0x3b1   : > { %v1195_v20 = vpop.xlane.xlu2 %1194 }
 0x3b2   : > { %v1199_v21 = vsub.f32 %v1180_v7, %v1195_v20  ;;  %v2338_v7 = vld [vmem:[%s3397_s18 + $0x78] sm:$0xf0]  ;;  %v2459_v20 = vld [vmem:[%s3397_s18 + $0x54] sm:$0xf0] }
 0x3b3   : > { %v2341_v8 = vor.u32 %v2462_v5, %v2338_v7 }
 0x3b4   : > { %v2655_v23 = vpop.eup %2654  ;;  %v1206_v24 = vmul.f32 1.442695, %v1199_v21  ;;  %v2458_v21 = vld [vmem:[%s3397_s18 + $0x54] sm:$0xf] }
 0x3b5   : > { %v1214_v25 = vsel %vm1183_vm5, %v2655_v23, 0.0 }
 0x3b6   : > { %2656 = vpow2.f32 %v1206_v24  ;;  %1215 = vadd.xlane.f32.xlu2 %v1214_v25  ;;  %v2322_v24 = vld [vmem:[%s3397_s18 + $0x58] sm:$0xf0] }
 0x3b7   : > { %v2325_v25 = vor.u32 %v2458_v21, %v2322_v24 }
 0x3b9   : > { %v1210_v26 = vpop.xlane.xlu2 %1209 }
 0x3ba   : > { %2658 = vrcp.f32 %v1210_v26  ;;  %v2312_v26 = vld [vmem:[%s3397_s18 + $0x40] sm:$0xf] }
 0x3bc   : > { %v2657_v27 = vpop.eup %2656  ;;  %v1078_v28 = vpop.permute.xlu0 %1077 }
 0x3bd   : > { %1269 = vmatpush.msrb.mxu3 %v1078_v28  ;;  %v1217_v29 = vsel %vm1183_vm5, %v2657_v27, 0.0  ;;  %v2456_v28 = vld [vmem:[%s3397_s18 + $0x44] sm:$0xf] }
 0x3be   : > { %1218 = vadd.xlane.f32.xlu1 %v1217_v29 }
 0x3c0   : > { %v2659_v30 = vpop.eup %2658 }
 0x3c1   : > { %v1224_v31 = vmul.f32 %v2659_v30, %v2651_v9  ;;  %v2314_v30 = vld [vmem:[%s3397_s18 + $0x48] sm:$0xf0] }
 0x3c3   : > { %2242 = vmatmul.msk.f32.vlgmr.msra.gmra.mxu3 %vm1183_vm5, %v1224_v31  ;;  %v2317_v31 = vor.u32 %v2456_v28, %v2314_v30 }
 0x3c4   : > { %1553 = vmatpush.bf16.msra.mxu3 %v2337_v6 }
 0x3c8   : > { %1554 = vmatpush.bf16.msra.mxu3 %v2329_v15 }
 0x3ce   : > { %1080 = vrot.lane.b32.xlu2 %v1058_v58, %s3088_s9 }
 0x3d7   : > { %1083 = vrot.lane.b32.xlu1 %v1058_v58, %s3087_s22 }
 0x421   : > { %v1213_v32 = vpop.xlane.xlu1 %1212 }
 0x422   : > { %2660 = vrcp.f32 %v1213_v32  ;;  %v2304_v32 = vld [vmem:[%s3397_s18 + $0x30] sm:$0xf] }
 0x428   : > { %v2661_v33 = vpop.eup %2660 }
 0x429   : > { %v1225_v34 = vmul.f32 %v2661_v33, %v2653_v16  ;;  %v1216_v35 = vpop.xlane.xlu2 %1215  ;;  %v2330_v16 = vld [vmem:[%s3397_s18 + $0x68] sm:$0xf0]  ;;  %v2455_v33 = vld [vmem:[%s3397_s18 + $0x34] sm:$0xf0] }
 0x42a   : > { %2662 = vrcp.f32 %v1216_v35  ;;  %v2333_v17 = vor.u32 %v2460_v14, %v2330_v16  ;;  %v2305_v35 = vor.u32 %v2455_v33, %v2304_v32  ;;  %v2477_v14 = vld [vmem:[%s3399_s10 + $0x68] sm:$0xff]  ;;  %v2468_v33 = vld [vmem:[%s3399_s10 + $0x20] sm:$0xff] }
 0x42b   : > { %2243 = vmatmul.msk.f32.vlgmr.msrb.gmra.mxu3 %vm1183_vm5, %v1225_v34  ;;  %v2454_v34 = vld [vmem:[%s3397_s18 + $0x34] sm:$0xf] }
 0x430   : > { %v2663_v36 = vpop.eup %2662 }
 0x431   : > { %v1081_v37 = vpop.permute.xlu2 %1080  ;;  %v1226_v38 = vmul.f32 %v2663_v36, %v2655_v23  ;;  %v1219_v39 = vpop.xlane.xlu1 %1218  ;;  %v2321_v23 = vor.u32 %v2459_v20, %v2320_v18  ;;  %v2306_v36 = vld [vmem:[%s3397_s18 + $0x38] sm:$0xf0]  ;;  %v2476_v20 = vld [vmem:[%s3399_s10 + $0x60] sm:$0xff] }
 0x432   : > { %1292 = vmatpush.msrb.mxu0 %v1081_v37  ;;  %2664 = vrcp.f32 %v1219_v39  ;;  %v2309_v37 = vor.u32 %v2454_v34, %v2306_v36  ;;  %v2453_v39 = vld [vmem:[%s3397_s18 + $0x24] sm:$0xf0] }
 0x433   : > { %2244 = vmatmul.msk.f32.vlgmr.msrb.gmra.mxu0 %vm1183_vm5, %v1226_v38  ;;  %1555 = vmatpush.bf16.msra.mxu3 %v2321_v23  ;;  %v2296_v38 = vld [vmem:[%s3397_s18 + $0x20] sm:$0xf] }
 0x434   : > { %1566 = vmatpush.bf16.msra.mxu0 %v2341_v8  ;;  %v2479_v8 = vld [vmem:[%s3399_s10 + $0x78] sm:$0xff] }
 0x435   : > { %1814 = vmatpush.bf16.msra.mxu2 %v2479_v8 }
 0x438   : > { %v2665_v40 = vpop.eup %2664  ;;  %1567 = vmatpush.bf16.msra.mxu0 %v2333_v17  ;;  %v2470_v17 = vld [vmem:[%s3399_s10 + $0x30] sm:$0xff] }
 0x439   : > { %v1227_v42 = vmul.f32 %v2665_v40, %v2657_v27  ;;  %v2457_v27 = vld [vmem:[%s3397_s18 + $0x44] sm:$0xf0]  ;;  %v2452_v40 = vld [vmem:[%s3397_s18 + $0x24] sm:$0xf] }
 0x43a   : > { %v2313_v29 = vor.u32 %v2457_v27, %v2312_v26 }
 0x43c   : > { %1568 = vmatpush.bf16.msra.mxu0 %v2325_v25  ;;  %1556 = vmatpush.bf16.msra.mxu3 %v2313_v29  ;;  %v2469_v25 = vld [vmem:[%s3399_s10 + $0x28] sm:$0xff]  ;;  %v2475_v29 = vld [vmem:[%s3399_s10 + $0x58] sm:$0xff] }
 0x440   : > { %1569 = vmatpush.bf16.msra.mxu0 %v2317_v31  ;;  %1557 = vmatpush.bf16.msra.mxu3 %v2305_v35 }
 0x444   : > { %1570 = vmatpush.bf16.msra.mxu0 %v2309_v37  ;;  %v2474_v37 = vld [vmem:[%s3399_s10 + $0x50] sm:$0xff] }
 0x446   : > { %v1248_v43 = vpop.f32.mrf.mxu3 }
 0x449   : > { %v1084_v41 = vpop.permute.xlu1 %1083 }
 0x44a   : > { %1315 = vmatpush.msrb.mxu1 %v1084_v41  ;;  %v2297_v41 = vor.u32 %v2453_v39, %v2296_v38 }
 0x44b   : > { %2245 = vmatmul.msk.f32.vlgmr.msrb.gmra.mxu1 %vm1183_vm5, %v1227_v42  ;;  %v2298_v42 = vld [vmem:[%s3397_s18 + $0x28] sm:$0xf0] }
 0x44c   : > { %1558 = vmatpush.bf16.msra.mxu3 %v2297_v41  ;;  %v2467_v41 = vld [vmem:[%s3399_s10 + $0x18] sm:$0xff] }
 0x4ae   : > { %v1271_v44 = vpop.f32.mrf.mxu3 }
 0x4af   : > { %1321 = vrot.lane.b32.xlu0 %v1271_v44, %s3087_s22  ;;  %v2288_v44 = vld [vmem:[%s3397_s18 + $0x10] sm:$0xf] }
 0x4b0   : > { %v1294_v45 = vpop.f32.mrf.mxu0 }
 0x4b1   : > { %1325 = vrot.lane.b32.xlu2 %v1294_v45, %s3088_s9  ;;  %v2451_v45 = vld [vmem:[%s3397_s18 + $0x14] sm:$0xf0] }
 0x4b2   : > { %v2289_v47 = vor.u32 %v2451_v45, %v2288_v44 }
 0x4b4   : > { %1559 = vmatpush.bf16.msra.mxu3 %v2289_v47 }
 0x4b8   : > { %1560 = vmatpush.bf16.msra.mxu3 %v2281_v53 }
 0x4c8   : > { %v1317_v46 = vpop.f32.mrf.mxu1 }
 0x4c9   : > { %1329 = vrot.lane.b32.xlu0 %v1317_v46, %s3089_s25  ;;  %v2450_v46 = vld [vmem:[%s3397_s18 + $0x14] sm:$0xf]  ;;  %s3823_s18 = scalar_lea.vmem [#allocation15], %s3377_s0 }
 0x4ca   : > { %v2293_v50 = vor.u32 %v2450_v46, %v2290_v48  ;;  %v2473_v46 = vld [vmem:[%s3399_s10 + $0x48] sm:$0xff] }
 0x50b   : > { %v1326_v56 = vpop.permute.xlu2 %1325 }
 0x521   : > { %v1322_v54 = vpop.permute.xlu0 %1321 }
 0x522   : > { %v1332_v55 = vsel %vm1086_vm4, %v1248_v43, %v1322_v54  ;;  %v2301_v43 = vor.u32 %v2452_v40, %v2298_v42  ;;  %v2285_v54 = vor.u32 %v2448_v51, %v2282_v52 }
 0x523   : > { %v1334_v58 = vsel %vm1333_vm6, %v1332_v55, %v1326_v56 }
 0x524   : > { %1571 = vmatpush.bf16.msra.mxu0 %v2301_v43 }
 0x528   : > { %1572 = vmatpush.bf16.msra.mxu0 %v2293_v50 }
 0x52c   : > { %1573 = vmatpush.bf16.msra.mxu0 %v2285_v54  ;;  %v2472_v54 = vld [vmem:[%s3399_s10 + $0x40] sm:$0xff] }
 0x53b   : > { %v1330_v57 = vpop.permute.xlu0 %1329 }
 0x53c   : > { %v1336_v59 = vsel %vm1335_vm7, %v1334_v58, %v1330_v57 }
 0x53d   : > { %v1337_v60 = vpack.c.bf16 %v1336_v59, %v1336_v59 }
 0x53f   : > { %1414 = vmatmul.bf16.vlgmr.msrb.gmra.mxu2 %v1337_v60 }
 0x5c2   : > { %v1415_v62 = vpop.f32.mrf.mxu2 }
 0x5c3   : > { %v1416_v63 = vadd.f32 %v2642_v61, %v1415_v62 }
 0x5c5   : > { %v3571_v0 = vadd.f32 %v1416_v63, %v3455_v3 }
 0x5c7   : > { %1422 = vadd.xlane.f32.xlu1 %v3571_v0 }
 0x5ca   : > { %v1417_v1 = vpop.f32.mrf.mxu2 }
 0x5cb   : > { %v2643_v1 = vld [vmem:[%s3823_s18] ss:$0 sm:$0xff] }
 0x63a   : > { %v1423_v3 = vpop.xlane.xlu1 %1422 }
 0x63b   : > { %v1424_v9 = vmul.f32 %v1423_v3, %v3464_v19  ;;  %v1467_v3 = vld [vmem:[%s3429_s29] sm:$0x3]  ;;  %s3826_s29 = sld [smem:[#allocation34_spill]] }
 0x63c   : > { %v1469_v16 = vperm.slane %v1467_v3, 0 }
 0x63d   : > { %v3580_v10 = vsub.f32 %v3571_v0, %v1424_v9  ;;  %v1470_v9 = vperm.slane %v1467_v3, 1 }
 0x63f   : > { %v1426_v11 = vmul.f32 %v3580_v10, %v3580_v10 }
 0x641   : > { %1427 = vadd.xlane.f32.xlu2 %v1426_v11  ;;  %v2478_v11 = vld [vmem:[%s3399_s10 + $0x70] sm:$0xff]  ;;  %p2408_p4 = scmp.ne.s32.totalorder %s3826_s29, 1 }
 0x642   : > { %1815 = vmatpush.bf16.msra.mxu2 %v2478_v11 }
 0x646   : > { %1816 = vmatpush.bf16.msra.mxu2 %v2477_v14 }
 0x64a   : > { %1817 = vmatpush.bf16.msra.mxu2 %v2476_v20 }
 0x64e   : > { %1818 = vmatpush.bf16.msra.mxu2 %v2475_v29 }
 0x652   : > { %1819 = vmatpush.bf16.msra.mxu2 %v2474_v37 }
 0x656   : > { %1820 = vmatpush.bf16.msra.mxu2 %v2473_v46 }
 0x65a   : > { %1821 = vmatpush.bf16.msra.mxu2 %v2472_v54 }
 0x6b4   : > { %v1428_v55 = vpop.xlane.xlu2 %1427 }
 0x6b5   : > { %v1429_v56 = vmul.f32 %v1428_v55, %v3464_v19 }
 0x6b7   : > { %v1430_v57 = vadd.f32 1e-05, %v1429_v56 }
 0x6b9   : > { %2666 = vrsqrt.f32 %v1430_v57  ;;  %vm1437_vm9 = vweird.f32 %v1430_v57 }
 0x6bf   : > { %v2667_v58 = vpop.eup %2666 }
 0x6c0   : > { %v1432_v59 = vmul.f32 %v2667_v58, %v1430_v57  ;;  %vm1438_vm8 = vweird.f32 %v2667_v58 }
 0x6c1   : > { %vm1439_vm10 = vmor %vm1437_vm9, %vm1438_vm8 }
 0x6c2   : > { %v1433_v60 = vmul.f32 %v2667_v58, %v1432_v59 }
 0x6c4   : > { %v1434_v61 = vmul.f32 0.5, %v1433_v60 }
 0x6c6   : > { %v1435_v62 = vsub.f32 1.5, %v1434_v61 }
 0x6c8   : > { %v1436_v63 = vmul.f32 %v2667_v58, %v1435_v62 }
 0x6ca   : > { %v1440_v2 = vsel %vm1439_vm10, %v2667_v58, %v1436_v63  ;;  %v2465_v58 = vld [vmem:[%s3399_s10 + $0x8] sm:$0xff] }
 0x6cb   : > { %v1441_v19 = vmul.f32 %v1440_v2, %v3580_v10  ;;  %v2471_v10 = vld [vmem:[%s3399_s10 + $0x38] sm:$0xff]  ;;  %v2464_v2 = vld [vmem:[%s3399_s10] sm:$0xff] }
 0x6cc   : > { %1801 = vmatpush.bf16.msra.mxu1 %v2471_v10 }
 0x6cd   : > { %v1445_v5 = vmul.f32 %v2643_v1, %v1441_v19 }
 0x6cf   : > { %v1449_v6 = vadd.f32 %v2644_v4, %v1445_v5 }
 0x6d0   : > { %1802 = vmatpush.bf16.msra.mxu1 %v2470_v17 }
 0x6d1   : > { %v1450_v7 = vpack.c.bf16 %v1449_v6, %v1449_v6 }
 0x6d3   : > { %1561 = vmatmul.bf16.vlgmr.msra.gmra.mxu3 %v1450_v7  ;;  %1574 = vmatmul.bf16.vlgmr.msra.gmra.mxu0 %v1450_v7 }
 0x6d4   : > { %1803 = vmatpush.bf16.msra.mxu1 %v2469_v25 }
 0x6d8   : > { %1804 = vmatpush.bf16.msra.mxu1 %v2468_v33 }
 0x6dc   : > { %1805 = vmatpush.bf16.msra.mxu1 %v2467_v41 }
 0x6e0   : > { %1806 = vmatpush.bf16.msra.mxu1 %v2466_v49 }
 0x6e4   : > { %1807 = vmatpush.bf16.msra.mxu1 %v2465_v58 }
 0x6e8   : > { %1808 = vmatpush.bf16.msra.mxu1 %v2464_v2 }
 0x750   : > { %v1575_v12 = vpop.f32.mrf.mxu0 }
 0x751   : > { %v3625_v13 = vadd.f32 %v1575_v12, %v1470_v9 }
 0x753   : > { %v3629_v15 = vmul.f32 0.70710677, %v3625_v13 }
 0x755   : > { %v1623_v18 = vmul.f32 %v3629_v15, %v3629_v15 }
 0x756   : > { %v1562_v21 = vpop.f32.mrf.mxu3 }
 0x757   : > { %v3635_v23 = vmin.f32 %v1623_v18, 16.0  ;;  %v3637_v24 = vadd.f32 %v1562_v21, %v1469_v16 }
 0x758   : > { %v1577_v26 = vpop.f32.mrf.mxu0 }
 0x759   : > { %v1625_v27 = vmul.f32 2.1237322e-06, %v3635_v23  ;;  %v1636_v28 = vmul.f32 3.8918573e-05, %v3635_v23  ;;  %v3644_v30 = vmul.f32 0.70710677, %v3637_v24 }
 0x75a   : > { %v1579_v49 = vmul.f32 0.5, %v3637_v24 }
 0x75b   : > { %v1626_v31 = vadd.f32 0.00028619796, %v1625_v27  ;;  %v1637_v32 = vadd.f32 0.001143296, %v1636_v28  ;;  %v1583_v34 = vmul.f32 %v3644_v30, %v3644_v30 }
 0x75d   : > { %v1627_v35 = vmul.f32 %v1626_v31, %v3635_v23  ;;  %v1638_v36 = vmul.f32 %v1637_v32, %v3635_v23  ;;  %v1584_v38 = vmin.f32 %v1583_v34, 16.0 }
 0x75e   : > { %v1564_v39 = vpop.f32.mrf.mxu3 }
 0x75f   : > { %v1639_v40 = vadd.f32 0.014752088, %v1638_v36  ;;  %v1628_v42 = vadd.f32 0.0036580483, %v1627_v35  ;;  %v1585_v43 = vmul.f32 2.1237322e-06, %v1584_v38 }
 0x760   : > { %v1596_v44 = vmul.f32 3.8918573e-05, %v1584_v38 }
 0x761   : > { %v1640_v45 = vmul.f32 %v1639_v40, %v3635_v23  ;;  %v1586_v47 = vadd.f32 0.00028619796, %v1585_v43  ;;  %v1629_v50 = vmul.f32 %v1628_v42, %v3635_v23  ;;  %v1580_v42 = vmul.f32 0.5, %v3625_v13  ;;  %v2645_v13 = vld [vmem:[%s781_s12] ss:$0 sm:$0xff] }
 0x762   : > { %v1597_v48 = vadd.f32 0.001143296, %v1596_v44 }
 0x763   : > { %v1641_v22 = vadd.f32 0.112945676, %v1640_v45  ;;  %v1587_v51 = vmul.f32 %v1586_v47, %v1584_v38  ;;  %v1630_v59 = vadd.f32 0.05243302, %v1629_v50 }
 0x764   : > { %v1598_v52 = vmul.f32 %v1597_v48, %v1584_v38 }
 0x765   : > { %v1642_v53 = vmul.f32 %v1641_v22, %v3635_v23  ;;  %v1588_v57 = vadd.f32 0.0036580483, %v1587_v51  ;;  %v1631_v19 = vmul.f32 %v1630_v59, %v3635_v23 }
 0x766   : > { %v1599_v55 = vadd.f32 0.014752088, %v1598_v52 }
 0x767   : > { %v1643_v56 = vadd.f32 0.4994258, %v1642_v53  ;;  %v1589_v1 = vmul.f32 %v1588_v57, %v1584_v38  ;;  %v1632_v7 = vadd.f32 0.18741608, %v1631_v19 }
 0x768   : > { %v1600_v60 = vmul.f32 %v1599_v55, %v1584_v38 }
 0x769   : > { %v1644_v61 = vmul.f32 %v1643_v56, %v3635_v23  ;;  %v1590_v6 = vadd.f32 0.05243302, %v1589_v1  ;;  %v1633_v10 = vmul.f32 %v1632_v7, %v3635_v23 }
 0x76a   : > { %v1601_v62 = vadd.f32 0.112945676, %v1600_v60 }
 0x76b   : > { %v1645_v63 = vadd.f32 1.0, %v1644_v61  ;;  %v1591_v11 = vmul.f32 %v1590_v6, %v1584_v38  ;;  %v1634_v18 = vadd.f32 1.1283791, %v1633_v10 }
 0x76c   : > { %v1602_v4 = vmul.f32 %v1601_v62, %v1584_v38 }
 0x76d   : > { %2668 = vrcp.f32 %v1645_v63  ;;  %v1657_v16 = vand.u32 2147483648, %v1645_v63  ;;  %v1592_v17 = vadd.f32 0.18741608, %v1591_v11  ;;  %v1655_v21 = vand.u32 2147483647, %v1645_v63 }
 0x76e   : > { %v1603_v5 = vadd.f32 0.4994258, %v1602_v4  ;;  %vm1651_vm12 = vweird.f32 %v1645_v63  ;;  %v1635_v31 = vmul.f32 %v1634_v18, %v3629_v15 }
 0x76f   : > { %v1658_v27 = vor.u32 1.1754944e-38, %v1657_v16  ;;  %v1593_v28 = vmul.f32 %v1592_v17, %v1584_v38  ;;  %vm1656_vm14 = vcmp.eq.f32.partialorder %v1655_v21, 8.507059e+37 }
 0x770   : > { %v1604_v8 = vmul.f32 %v1603_v5, %v1584_v38 }
 0x771   : > { %v1594_v36 = vadd.f32 1.1283791, %v1593_v28 }
 0x772   : > { %v1605_v3 = vadd.f32 1.0, %v1604_v8 }
 0x773   : > { %v2669_v9 = vpop.eup %2668  ;;  %v1595_v15 = vmul.f32 %v1594_v36, %v3644_v30 }
 0x774   : > { %v1647_v12 = vmul.f32 %v2669_v9, %v1645_v63  ;;  %2670 = vrcp.f32 %v1605_v3  ;;  %vm1652_vm11 = vweird.f32 %v2669_v9  ;;  %v1617_v35 = vand.u32 2147483648, %v1605_v3 }
 0x775   : > { %vm1653_vm13 = vmor %vm1651_vm12, %vm1652_vm11  ;;  %v1615_v39 = vand.u32 2147483647, %v1605_v3  ;;  %vm1611_vm0 = vweird.f32 %v1605_v3 }
 0x776   : > { %v1648_v14 = vsub.f32 1.0, %v1647_v12  ;;  %v1618_v38 = vor.u32 1.1754944e-38, %v1617_v35 }
 0x777   : > { %vm1616_vm2 = vcmp.eq.f32.partialorder %v1615_v39, 8.507059e+37 }
 0x778   : > { %v1649_v20 = vmul.f32 %v2669_v9, %v1648_v14 }
 0x77a   : > { %v2671_v25 = vpop.eup %2670  ;;  %v1650_v26 = vadd.f32 %v2669_v9, %v1649_v20 }
 0x77b   : > { %v1607_v29 = vmul.f32 %v2671_v25, %v1605_v3  ;;  %vm1612_vm15 = vweird.f32 %v2671_v25 }
 0x77c   : > { %v1654_v32 = vsel %vm1653_vm13, %v2669_v9, %v1650_v26  ;;  %vm1613_vm1 = vmor %vm1611_vm0, %vm1612_vm15 }
 0x77d   : > { %v1659_v23 = vsel %vm1656_vm14, %v1658_v27, %v1654_v32  ;;  %v1608_v33 = vsub.f32 1.0, %v1607_v29 }
 0x77e   : > { %v1660_v34 = vmul.f32 %v1659_v23, %v1635_v31 }
 0x77f   : > { %v1609_v37 = vmul.f32 %v2671_v25, %v1608_v33 }
 0x780   : > { %v2343_v40 = vclamps-f32 %v1660_v34, 1.0 }
 0x781   : > { %v1610_v41 = vadd.f32 %v2671_v25, %v1609_v37 }
 0x782   : > { %v1664_v43 = vadd.f32 1.0, %v2343_v40 }
 0x783   : > { %v1614_v44 = vsel %vm1613_vm1, %v2671_v25, %v1610_v41 }
 0x784   : > { %v1666_v45 = vmul.f32 %v1664_v43, %v1580_v42  ;;  %v1619_v46 = vsel %vm1616_vm2, %v1618_v38, %v1614_v44 }
 0x785   : > { %v1620_v47 = vmul.f32 %v1619_v46, %v1595_v15 }
 0x786   : > { %v1668_v48 = vpack.c.bf16 %v1666_v45, %v1666_v45 }
 0x787   : > { %v2342_v22 = vclamps-f32 %v1620_v47, 1.0 }
 0x788   : > { %1822 = vmatmul.bf16.vlgmr.msra.gmra.mxu2 %v1668_v48 }
 0x789   : > { %v1663_v50 = vadd.f32 1.0, %v2342_v22 }
 0x78b   : > { %v1665_v51 = vmul.f32 %v1663_v50, %v1579_v49 }
 0x78d   : > { %v1667_v52 = vpack.c.bf16 %v1665_v51, %v1665_v51 }
 0x78f   : > { %1809 = vmatmul.bf16.vlgmr.msra.gmra.mxu1 %v1667_v52 }
 0x80b   : > { %v1823_v30 = vpop.f32.mrf.mxu2 }
 0x80c   : > { %v1810_v53 = vpop.f32.mrf.mxu1 }
 0x80d   : > { %v1811_v54 = vadd.f32 %v2645_v13, %v1810_v53 }
 0x80f   : > { %v1824_v55 = vadd.f32 %v1823_v30, %v1811_v54 }
 0x810   : > { %1832 = sbr.rel (%p2408_p4) target bundleno = 2070 (0x816), region = 117 }
 0x811   : > { %v1827_v56 = vadd.f32 %v1824_v55, %v3571_v0 }
 0x813   : > { %1828 = vst [vmem:[#allocation2] sm:$0xff] %v1827_v56  ;;  %v1825_v57 = vpop.f32.mrf.mxu2 }
 0x814   : > { %v1812_v58 = vpop.f32.mrf.mxu1 }
 0x815   : > { %1833 = vst [vmem:[%s771_s23] sm:$0xff] %v1827_v56 }
 0x816 PF: > { %s3827_s21 = sld [smem:[#allocation35_spill]]  ;;  %s1847_s20 = sshll.u32 %s771_s23, 4  ;;  %s1848_s20 = int_to_ptr.vmem [resolvable:$true] %s1847_s20 }
 0x817   : > { %s3828_s13 = sld [smem:[#allocation58_spill]]  ;;  %s3829_s11 = sand.u32 1, %s3040_s30  }
 0x818   : > { %s1835_s19 = scalar_lea.sflag [#allocation5], %s3829_s11 }
 0x81c   : > { %s2410_s6 = sshll.u32 %s3827_s21, 3 }
 0x81d   : > { %s1845_s8 = scalar_lea.hbm %s3828_s13, %s2410_s6  ;;  %s2956_s5 = scalar_lea.hbm %s3828_s13, 16 }
 0x81e   : > { %s1849_s24 = sshll.u32 %s1845_s8, 4  ;;  %s1850_s24 = int_to_ptr.hbm [resolvable:$true] %s1849_s24 }
 0x81f   : > { %s2950_s28 = sshra.s32 %s1850_s24, 4  ;;  %s2951_s28 = int_to_ptr.hbm [resolvable:$true] %s2950_s28 }
 0x820   : > { %s2952_s22 = scalar_lea.hbm %s2951_s28, 8  ;;  %p2957_p11 = scmp.lt.s32.totalorder %s2951_s28, %s3828_s13 }
 0x821   : > { %p2953_p5 = scmp.ne.s32.totalorder %s2951_s28, %s2952_s22  ;;  %p2958_p6 = scmp.lt.s32.totalorder %s2956_s5, %s2952_s22 }
 0x823   : > { %p2954_p7 = pnand %p2953_p5, %p3313_p2  ;;  %p2959_p8 = por %p2958_p6, %p2957_p11 }
 0x825   : > { %p2955_p9 = pneg %p2954_p7 }
 0x827   : > { %p2960_p10 = pnand %p2959_p8, %p2955_p9 }
 0x829   : > { %2963 = shalt.err (!%p2960_p10)
}
 0x82a   : > { %2504 = dma.vmem_to_hbm [thread:$0]  (%p3313_p2), %s1848_s20, 128, %s1850_s24, %s1835_s19  }
 0x82b PF: > { %s3830_s23 = sld [smem:[#allocation38_spill]] }
 0x82c   : > { %s3831_s2 = sld [smem:[#allocation30_spill]] }
 0x831   : > { %p2539_p12 = scmp.ge.s32.totalorder %s3830_s23, 2 }
 0x832   : > { %s1861_s18 = sand.u32 1, %s3831_s2  }
 0x833   : > { %p2533_p13 = pnand %p2539_p12, %p3317_p3  ;;  %s1862_s26 = scalar_lea.sflag [#allocation5], %s1861_s18 }
 0x835   : > { %p2534_p0 = pneg %p2533_p13 }
 0x837   : > { %3031 = dma.done.wait (%p2534_p0), %s1862_s26, 128  }
 0x838   : > { %3033 = vsyncadd (%p2534_p0), %s1862_s26, 4294967168  ;;  %s40_s23 = sadd.s32 1, %s3830_s23   ;;  %s3833_s4 = sld [smem:[#allocation31_spill]] }
 0x839   : > { %p37_p1 = scmp.ge.s32.totalorder %s40_s23, 6   ;;  %s3834_s15 = sld [smem:[#allocation43_spill]] }
 0x83a   : > { %s3835_s16 = sld [smem:[#allocation32_spill]]  ;;  %s3842_s29 = smov %s3040_s30 }
 0x83b   : > { %s3836_s17 = sld [smem:[#allocation33_spill]] }
 0x83c   : > { %s3837_s18 = sld [smem:[#allocation40_spill]]  ;;  %39 = sbr.rel (!%p37_p1) target bundleno = 32 (0x20), region = 223 }
 0x83d   : > { %s3838_s19 = sld [smem:[#allocation36_spill]] }
 0x83e   : > { %s3839_s20 = sld [smem:[#allocation37_spill]]  ;;  %s3843_s30 = smov %s3833_s4 }
 0x83f   : > { %s3840_s21 = sld [smem:[#allocation39_spill]] }
 0x840   : > { %s3841_s22 = sld [smem:[#allocation41_spill]] }
 0x841   :  { %1868 = vsyncpa [#allocation4], 1 }
 0x842   :  { %1870 = vsyncpa [#allocation4 + $0x1], 1 }
 0x843   :  { %1871 = vsyncpa [#allocation7], 1 }
 0x844   :  { %1873 = vsyncpa [#allocation7 + $0x1], 1 }
 0x845   :  { %1874 = vsyncpa [#allocation10], 1 }
 0x846   :  { %1876 = vsyncpa [#allocation10 + $0x1], 1 }
 0x847   :  { %1877 = vsyncpa [#allocation13], 1 }
 0x848   :  { %1879 = vsyncpa [#allocation13 + $0x1], 1 }
 0x849   :  { %1880 = vsyncpa [#allocation16], 1 }
 0x84a   :  { %1882 = vsyncpa [#allocation16 + $0x1], 1 }
 0x84b   :  { %1883 = vsyncpa [#allocation5], 1 }
 0x84c   :  { %1885 = vsyncpa [#allocation5 + $0x1], 1 }

</bundles_post_ra>
